<compile_context>
chip_gen: v6e
topology: v6e:2x2x1
jax: 0.10.0
libtpu: 0.0.40
codegen_flags: <defaults>
</compile_context>

<pallas_src>
import functools
import math

import jax
import jax.numpy as jnp
from jax.experimental import pallas as pl
from jax.experimental.pallas import tpu as pltpu

LN_EPS = 1e-12            # nn.LayerNorm(embed_dim, eps=1e-12)
NEG_BIAS = -1e30          # finite large-negative causal bias (avoids inf-inf NaN)
_VMEM_LIMIT_BYTES = 64 * 1024 * 1024   # raise the 16/32 MiB default scoped VMEM


def _tile(dim, pref):
    """Largest tile <= pref that divides `dim` (pref, pref/2, ...); else full dim."""
    if dim <= pref:
        return dim
    t = pref
    while t >= 8:
        if dim % t == 0:
            return t
        t //= 2
    return dim


# ----------------------------------------------------------------------------
# Kernel 1: LayerNorm1 + fused QKV projection (column-tiled weight)
# ----------------------------------------------------------------------------

def _ln_qkv_kernel(h_ref, g_ref, b_ref, w_ref, bias_ref,
                   h2_ref, qkv_ref, h2_scr):
    """grid = (row tiles [parallel], 3E column tiles [arbitrary]).

    LN stats are computed once per row tile (j == 0) into f32 scratch; each j
    step multiplies against one (E, tn) column slab of the fused QKV weight so
    the weight is never fully VMEM-resident.
    """
    j = pl.program_id(1)

    @pl.when(j == 0)
    def _():
        x = h_ref[...].astype(jnp.float32)
        mu = jnp.mean(x, axis=-1, keepdims=True)
        var = jnp.mean(jnp.square(x - mu), axis=-1, keepdims=True)
        h2 = (x - mu) * jax.lax.rsqrt(var + LN_EPS) * g_ref[...] + b_ref[...]
        h2_scr[...] = h2
        h2_ref[...] = h2.astype(h2_ref.dtype)

    qkv_ref[...] = (jnp.dot(h2_scr[...].astype(w_ref.dtype), w_ref[...],
                            preferred_element_type=jnp.float32)
                    + bias_ref[...]).astype(qkv_ref.dtype)


def ln1_qkv_block(h2d, layer, *, row_tile=256, col_tile=512):
    """h2d: (M, E) bf16 -> (h2 (M,E), qkv (M,3E)) bf16."""
    M, E = h2d.shape
    threeE = 3 * E
    tm = _tile(M, row_tile)
    tn = _tile(threeE, col_tile)
    return pl.pallas_call(
        _ln_qkv_kernel,
        out_shape=(jax.ShapeDtypeStruct((M, E), h2d.dtype),
                   jax.ShapeDtypeStruct((M, threeE), h2d.dtype)),
        grid=(M // tm, threeE // tn),
        in_specs=[
            pl.BlockSpec((tm, E), lambda i, j: (i, 0)),        # activations (resident over j)
            pl.BlockSpec((1, E), lambda i, j: (0, 0)),         # LN1 gamma
            pl.BlockSpec((1, E), lambda i, j: (0, 0)),         # LN1 beta
            pl.BlockSpec((E, tn), lambda i, j: (0, j)),        # Wqkv column slab
            pl.BlockSpec((1, tn), lambda i, j: (0, j)),        # bqkv column slab
        ],
        out_specs=(pl.BlockSpec((tm, E), lambda i, j: (i, 0)),
                   pl.BlockSpec((tm, tn), lambda i, j: (i, j))),
        scratch_shapes=[pltpu.VMEM((tm, E), jnp.float32)],
        compiler_params=pltpu.CompilerParams(
            dimension_semantics=("parallel", "arbitrary"),
            vmem_limit_bytes=_VMEM_LIMIT_BYTES),
    )(h2d, layer['ln1_g'].reshape(1, E), layer['ln1_b'].reshape(1, E),
      layer['in_proj_w'], layer['in_proj_b'].reshape(1, threeE))


# ----------------------------------------------------------------------------
# Kernel 2: batched-head flash attention + out-proj + residual
# ----------------------------------------------------------------------------

def _flash_attn_kernel(q_ref, k_ref, v_ref, h2_ref, wout_ref, bout_ref,
                       o_ref, m_scr, l_scr, acc_scr,
                       *, num_heads, q_tile, k_tile, causal):
    """grid = (batch [parallel], q tiles [parallel], kv tiles [arbitrary]).

    q/k/v refs are head-major (nh, tile, D); both MXU matmuls are batched over
    heads (no per-head lane slices, no concat).  Online-softmax state lives in
    VMEM scratch, so VMEM use is bounded by (tq, tk) and not by S.
    """
    ki = pl.program_id(2)
    mm_t = k_ref.dtype

    @pl.when(ki == 0)
    def _():
        m_scr[...] = jnp.full_like(m_scr, -jnp.inf)
        l_scr[...] = jnp.zeros_like(l_scr)
        acc_scr[...] = jnp.zeros_like(acc_scr)

    q_start = pl.program_id(1) * q_tile
    k_start = ki * k_tile

    def update():
        s = jnp.einsum('hqd,hkd->hqk', q_ref[...], k_ref[...],
                       preferred_element_type=jnp.float32)        # (nh, tq, tk) f32
        if causal:
            # mask only for the current (tq, tk) tile
            rows = q_start + jax.lax.broadcasted_iota(jnp.int32, (q_tile, k_tile), 0)
            cols = k_start + jax.lax.broadcasted_iota(jnp.int32, (q_tile, k_tile), 1)
            s = s + jnp.where(cols > rows, jnp.float32(NEG_BIAS), jnp.float32(0.0))
        m_prev = m_scr[...]
        m_new = jnp.maximum(m_prev, jnp.max(s, axis=-1, keepdims=True))
        alpha = jnp.exp(m_prev - m_new)
        p = jnp.exp(s - m_new)
        l_scr[...] = alpha * l_scr[...] + jnp.sum(p, axis=-1, keepdims=True)
        acc_scr[...] = alpha * acc_scr[...] + jnp.einsum(
            'hqk,hkd->hqd', p.astype(mm_t), v_ref[...],
            preferred_element_type=jnp.float32)
        m_scr[...] = m_new

    if causal:
        # Skip KV tiles that are entirely above the diagonal (~2x MXU saving).
        @pl.when(k_start <= q_start + q_tile - 1)
        def _():
            update()
    else:
        update()

    @pl.when(ki == pl.num_programs(2) - 1)
    def _():
        inv_l = pl.reciprocal(l_scr[...], approx=True)             # EUP slot
        attn = (acc_scr[...] * inv_l).astype(mm_t)                 # (nh, tq, D)
        # out-projection + bias + residual (residual is the LN1'd value h2).
        y = h2_ref[...].astype(jnp.float32) + bout_ref[...]
        for hh in range(num_heads):   # leading-dim indexing only; finalize-only loop
            y = y + jnp.dot(attn[hh], wout_ref[hh],
                            preferred_element_type=jnp.float32)
        o_ref[...] = y.astype(o_ref.dtype)


def attention_block(q, k, v, h2, layer, *, num_heads, causal,
                    q_tile=256, k_tile=256):
    """q/k/v: (B, nh, S, D) bf16 head-major; h2: (B, S, E) bf16 -> (B, S, E) bf16."""
    B, nh, S, D = q.shape
    E = nh * D
    tq = _tile(S, q_tile)
    tk = _tile(S, k_tile)
    kernel = functools.partial(_flash_attn_kernel, num_heads=num_heads,
                               q_tile=tq, k_tile=tk, causal=causal)
    wout3 = layer['out_w'].reshape(nh, D, E)   # row-group per head (matches concat order)
    return pl.pallas_call(
        kernel,
        out_shape=jax.ShapeDtypeStruct((B, S, E), q.dtype),
        grid=(B, S // tq, S // tk),
        in_specs=[
            pl.BlockSpec((None, nh, tq, D), lambda b, qi, ki: (b, 0, qi, 0)),  # q
            pl.BlockSpec((None, nh, tk, D), lambda b, qi, ki: (b, 0, ki, 0)),  # k
            pl.BlockSpec((None, nh, tk, D), lambda b, qi, ki: (b, 0, ki, 0)),  # v
            pl.BlockSpec((None, tq, E), lambda b, qi, ki: (b, qi, 0)),         # residual h2
            pl.BlockSpec((nh, D, E), lambda b, qi, ki: (0, 0, 0)),             # Wout (resident)
            pl.BlockSpec((1, E), lambda b, qi, ki: (0, 0)),                    # bout
        ],
        out_specs=pl.BlockSpec((None, tq, E), lambda b, qi, ki: (b, qi, 0)),
        scratch_shapes=[
            pltpu.VMEM((nh, tq, 1), jnp.float32),   # running max  m
            pltpu.VMEM((nh, tq, 1), jnp.float32),   # running sum  l
            pltpu.VMEM((nh, tq, D), jnp.float32),   # output accumulator
        ],
        compiler_params=pltpu.CompilerParams(
            dimension_semantics=("parallel", "parallel", "arbitrary"),
            vmem_limit_bytes=_VMEM_LIMIT_BYTES),
    )(q, k, v, h2, wout3, layer['out_b'].reshape(1, E))


# ----------------------------------------------------------------------------
# Kernel 3: LayerNorm2 + FFN (hidden dim tiled as a reduction) + residual
# ----------------------------------------------------------------------------

def _ffn_kernel(y_ref, g_ref, b_ref, w1_ref, b1_ref, w2_ref, b2_ref,
                o_ref, h2_scr, acc_scr):
    """grid = (row tiles [parallel], hidden-dim tiles [arbitrary]).

    FF1 is tiled over H columns, FF2 treats H as a reduction into an f32
    accumulator; neither (E, H) weight is ever fully resident and the ReLU
    intermediate is only (tm, th).
    """
    j = pl.program_id(1)

    @pl.when(j == 0)
    def _():
        x = y_ref[...].astype(jnp.float32)
        mu = jnp.mean(x, axis=-1, keepdims=True)
        var = jnp.mean(jnp.square(x - mu), axis=-1, keepdims=True)
        h2_scr[...] = (x - mu) * jax.lax.rsqrt(var + LN_EPS) * g_ref[...] + b_ref[...]
        acc_scr[...] = jnp.zeros_like(acc_scr)

    mm_t = w1_ref.dtype
    z = jnp.dot(h2_scr[...].astype(mm_t), w1_ref[...],
                preferred_element_type=jnp.float32) + b1_ref[...]   # (tm, th)
    z = jnp.maximum(z, 0.0)
    acc_scr[...] += jnp.dot(z.astype(mm_t), w2_ref[...],
                            preferred_element_type=jnp.float32)      # (tm, E)

    @pl.when(j == pl.num_programs(1) - 1)
    def _():
        o_ref[...] = (acc_scr[...] + b2_ref[...] + h2_scr[...]).astype(o_ref.dtype)


def ffn_block(y2d, layer, *, row_tile=256, h_tile=512):
    """y2d: (M, E) bf16 -> (M, E) bf16."""
    M, E = y2d.shape
    H = layer['ff1_w'].shape[1]
    tm = _tile(M, row_tile)
    th = _tile(H, h_tile)
    return pl.pallas_call(
        _ffn_kernel,
        out_shape=jax.ShapeDtypeStruct((M, E), y2d.dtype),
        grid=(M // tm, H // th),
        in_specs=[
            pl.BlockSpec((tm, E), lambda i, j: (i, 0)),        # activations (resident over j)
            pl.BlockSpec((1, E), lambda i, j: (0, 0)),         # LN2 gamma
            pl.BlockSpec((1, E), lambda i, j: (0, 0)),         # LN2 beta
            pl.BlockSpec((E, th), lambda i, j: (0, j)),        # FF1 column slab
            pl.BlockSpec((1, th), lambda i, j: (0, j)),        # FF1 bias slab
            pl.BlockSpec((th, E), lambda i, j: (j, 0)),        # FF2 row slab
            pl.BlockSpec((1, E), lambda i, j: (0, 0)),         # FF2 bias
        ],
        out_specs=pl.BlockSpec((tm, E), lambda i, j: (i, 0)),
        scratch_shapes=[pltpu.VMEM((tm, E), jnp.float32),      # LN2 output (residual)
                        pltpu.VMEM((tm, E), jnp.float32)],     # FF2 accumulator
        compiler_params=pltpu.CompilerParams(
            dimension_semantics=("parallel", "arbitrary"),
            vmem_limit_bytes=_VMEM_LIMIT_BYTES),
    )(y2d, layer['ln2_g'].reshape(1, E), layer['ln2_b'].reshape(1, E),
      layer['ff1_w'], layer['ff1_b'].reshape(1, H),
      layer['ff2_w'], layer['ff2_b'].reshape(1, E))


# ----------------------------------------------------------------------------
# Parameter init (deterministic, synthetic) and forward pass
# ----------------------------------------------------------------------------

def init_params(key, *, num_layers, embed_dim, hidden_dim, num_embeddings,
                num_max_positions, num_heads, matmul_dtype=jnp.bfloat16):
    E, H = embed_dim, hidden_dim
    D = E // num_heads
    scale = 1.0 / math.sqrt(D)
    keys = jax.random.split(key, 2 + num_layers)
    params = {
        'tok_emb': 0.02 * jax.random.normal(keys[0], (num_embeddings, E), jnp.float32),
        'pos_emb': 0.02 * jax.random.normal(keys[1], (num_max_positions, E), jnp.float32),
        'layers': [],
    }
    for l in range(num_layers):
        lk = jax.random.split(keys[2 + l], 8)
        in_w = 0.02 * jax.random.normal(lk[0], (E, 3 * E), jnp.float32)
        in_b = 0.01 * jax.random.normal(lk[1], (3 * E,), jnp.float32)
        # Fold the 1/sqrt(D) attention scale into the Q third of the fused
        # projection (weight AND bias, matching nn.MultiheadAttention which
        # scales q after the in-projection) -> no in-kernel Q scaling.
        in_w = in_w.at[:, :E].multiply(scale)
        in_b = in_b.at[:E].multiply(scale)
        layer = {
            'ln1_g': jnp.ones((E,), jnp.float32),
            'ln1_b': jnp.zeros((E,), jnp.float32),
            'ln2_g': jnp.ones((E,), jnp.float32),
            'ln2_b': jnp.zeros((E,), jnp.float32),
            # Weights stored pre-transposed (in, out) and in bf16 (MXU input
            # dtype; accumulation stays f32 in-kernel). Biases stay f32.
            'in_proj_w': in_w.astype(matmul_dtype),
            'in_proj_b': in_b,
            'out_w': (0.02 * jax.random.normal(lk[2], (E, E))).astype(matmul_dtype),
            'out_b': 0.01 * jax.random.normal(lk[3], (E,), jnp.float32),
            'ff1_w': (0.02 * jax.random.normal(lk[4], (E, H))).astype(matmul_dtype),
            'ff1_b': 0.01 * jax.random.normal(lk[5], (H,), jnp.float32),
            'ff2_w': (0.02 * jax.random.normal(lk[6], (H, E))).astype(matmul_dtype),
            'ff2_b': 0.01 * jax.random.normal(lk[7], (E,), jnp.float32),
        }
        params['layers'].append(layer)
    return params


def transformer_forward(params, x_ids, *, num_heads, causal=False):
    # x_ids: (S, B) int32 token ids, seq-first like the PyTorch module.
    S, B = x_ids.shape
    E = params['tok_emb'].shape[1]
    D = E // num_heads
    M = B * S
    act_t = params['layers'][0]['in_proj_w'].dtype   # bf16 inter-layer activations

    # Embedding gather + positional add: plain-JAX glue (HBM gather).
    h = jnp.take(params['tok_emb'], x_ids.T, axis=0)          # (B, S, E) f32
    h = h + params['pos_emb'][:S][None, :, :]
    h = h.astype(act_t)
    # dropout -> identity (inference semantics)

    for layer in params['layers']:
        h2, qkv = ln1_qkv_block(h.reshape(M, E), layer)        # (M,E), (M,3E) bf16
        # Split q/k/v and re-layout head-major (B, nh, S, D): plain-XLA glue so
        # the flash kernel needs no in-kernel transposes / lane slicing.
        def _heads(cols):
            return cols.reshape(B, S, num_heads, D).transpose(0, 2, 1, 3)
        q = _heads(qkv[:, :E])
        k = _heads(qkv[:, E:2 * E])
        v = _heads(qkv[:, 2 * E:])
        y = attention_block(q, k, v, h2.reshape(B, S, E), layer,
                            num_heads=num_heads, causal=causal)   # (B, S, E) bf16
        h = ffn_block(y.reshape(M, E), layer).reshape(B, S, E)

    # back to the module's seq-first output layout (S, B, E)
    return h.transpose(1, 0, 2).astype(jnp.float32)


# ----------------------------------------------------------------------------
# Demo
# ----------------------------------------------------------------------------

if __name__ == "__main__":
    embed_dim = 32
    hidden_dim = 64
    num_embeddings = 100
    num_max_positions = 16
    num_heads = 4
    num_layers = 2
    S, B = 8, 2   # seq-first layout: x is (S, B)

    key = jax.random.PRNGKey(0)
    pkey, xkey = jax.random.split(key)
    params = init_params(
        pkey,
        num_layers=num_layers,
        embed_dim=embed_dim,
        hidden_dim=hidden_dim,
        num_embeddings=num_embeddings,
        num_max_positions=num_max_positions,
        num_heads=num_heads,
    )
    x_ids = jax.random.randint(xkey, (S, B), 0, num_embeddings, dtype=jnp.int32)

    fwd = jax.jit(functools.partial(transformer_forward,
                                    num_heads=num_heads, causal=False))
    out = fwd(params, x_ids)
    jax.block_until_ready(out)
    assert out.shape == (S, B, embed_dim)
    assert bool(jnp.all(jnp.isfinite(out)))

    # also exercise the causal-mask (flash tile-skip) path
    fwd_c = jax.jit(functools.partial(transformer_forward,
                                      num_heads=num_heads, causal=True))
    out_c = fwd_c(params, x_ids)
    jax.block_until_ready(out_c)
    assert out_c.shape == (S, B, embed_dim)
    assert bool(jnp.all(jnp.isfinite(out_c)))

    print("KERNEL_OK")
</pallas_src>

<mosaic_0001>
module attributes {stable_mosaic.version = 11 : i64} {
  func.func @_ln_qkv_kernel(%arg0: i32, %arg1: i32, %arg2: memref<16x32xbf16, #tpu.memory_space<vmem>>, %arg3: memref<1x32xf32, #tpu.memory_space<vmem>>, %arg4: memref<1x32xf32, #tpu.memory_space<vmem>>, %arg5: memref<32x96xbf16, #tpu.memory_space<vmem>>, %arg6: memref<1x96xf32, #tpu.memory_space<vmem>>, %arg7: memref<16x32xbf16, #tpu.memory_space<vmem>>, %arg8: memref<16x96xbf16, #tpu.memory_space<vmem>>, %arg9: memref<16x32xf32, #tpu.memory_space<vmem>>) attributes {dimension_semantics = [#tpu.dimension_semantics<parallel>, #tpu.dimension_semantics<arbitrary>], iteration_bounds = array<i64: 1, 1>, scalar_prefetch = 0 : i64, scratch_operands = 1 : i64, tpu.core_type = #tpu.core_type<tc>, window_params = [{transform_indices = @transform_0, window_bounds = array<i64: 16, 32>}, {pipeline_mode = #tpu.pipeline_mode<synchronous>, transform_indices = @transform_1, window_bounds = array<i64: 1, 32>}, {pipeline_mode = #tpu.pipeline_mode<synchronous>, transform_indices = @transform_2, window_bounds = array<i64: 1, 32>}, {transform_indices = @transform_3, window_bounds = array<i64: 32, 96>}, {transform_indices = @transform_4, window_bounds = array<i64: 1, 96>}, {transform_indices = @transform_5, window_bounds = array<i64: 16, 32>}, {transform_indices = @transform_6, window_bounds = array<i64: 16, 96>}]} {
    %c0_i32 = arith.constant 0 : i32
    %0 = arith.cmpi eq, %arg1, %c0_i32 : i32
    %1 = arith.extui %0 : i1 to i32
    %c0_i32_0 = arith.constant 0 : i32
    %2 = arith.cmpi ne, %1, %c0_i32_0 : i32
    scf.if %2 {
      %c0_8 = arith.constant 0 : index
      %c0_9 = arith.constant 0 : index
      %12 = vector.load %arg2[%c0_8, %c0_9] : memref<16x32xbf16, #tpu.memory_space<vmem>>, vector<16x32xbf16>
      %13 = arith.extf %12 : vector<16x32xbf16> to vector<16x32xf32>
      %cst_10 = arith.constant dense<0.000000e+00> : vector<16xf32>
      %14 = vector.multi_reduction <add>, %13, %cst_10 [1] : vector<16x32xf32> to vector<16xf32>
      %15 = vector.shape_cast %14 : vector<16xf32> to vector<16x1xf32>
      %cst_11 = arith.constant 3.200000e+01 : f32
      %16 = vector.broadcast %cst_11 : f32 to vector<16x1xf32>
      %17 = arith.divf %15, %16 : vector<16x1xf32>
      %18 = vector.broadcast %17 : vector<16x1xf32> to vector<16x32xf32>
      %19 = arith.subf %13, %18 : vector<16x32xf32>
      %20 = arith.mulf %19, %19 : vector<16x32xf32>
      %cst_12 = arith.constant dense<0.000000e+00> : vector<16xf32>
      %21 = vector.multi_reduction <add>, %20, %cst_12 [1] : vector<16x32xf32> to vector<16xf32>
      %22 = vector.shape_cast %21 : vector<16xf32> to vector<16x1xf32>
      %cst_13 = arith.constant 3.200000e+01 : f32
      %23 = vector.broadcast %cst_13 : f32 to vector<16x1xf32>
      %24 = arith.divf %22, %23 : vector<16x1xf32>
      %25 = vector.broadcast %17 : vector<16x1xf32> to vector<16x32xf32>
      %26 = arith.subf %13, %25 : vector<16x32xf32>
      %cst_14 = arith.constant 9.99999996E-13 : f32
      %27 = vector.broadcast %cst_14 : f32 to vector<16x1xf32>
      %28 = arith.addf %24, %27 : vector<16x1xf32>
      %29 = math.rsqrt %28 : vector<16x1xf32>
      %30 = vector.broadcast %29 : vector<16x1xf32> to vector<16x32xf32>
      %31 = arith.mulf %26, %30 : vector<16x32xf32>
      %c0_15 = arith.constant 0 : index
      %c0_16 = arith.constant 0 : index
      %32 = vector.load %arg3[%c0_15, %c0_16] : memref<1x32xf32, #tpu.memory_space<vmem>>, vector<1x32xf32>
      %33 = vector.broadcast %32 : vector<1x32xf32> to vector<16x32xf32>
      %34 = arith.mulf %31, %33 : vector<16x32xf32>
      %c0_17 = arith.constant 0 : index
      %c0_18 = arith.constant 0 : index
      %35 = vector.load %arg4[%c0_17, %c0_18] : memref<1x32xf32, #tpu.memory_space<vmem>>, vector<1x32xf32>
      %36 = vector.broadcast %35 : vector<1x32xf32> to vector<16x32xf32>
      %37 = arith.addf %34, %36 : vector<16x32xf32>
      %c0_19 = arith.constant 0 : index
      %c0_20 = arith.constant 0 : index
      %38 = vector.load %arg9[%c0_19, %c0_20] : memref<16x32xf32, #tpu.memory_space<vmem>>, vector<16x32xf32>
      tpu.vector_store %arg9[%c0_19, %c0_20], %37 {strides = array<i32>} : memref<16x32xf32, #tpu.memory_space<vmem>>, vector<16x32xf32>,
      %39 = arith.truncf %37 : vector<16x32xf32> to vector<16x32xbf16>
      %c0_21 = arith.constant 0 : index
      %c0_22 = arith.constant 0 : index
      %40 = vector.load %arg7[%c0_21, %c0_22] : memref<16x32xbf16, #tpu.memory_space<vmem>>, vector<16x32xbf16>
      tpu.vector_store %arg7[%c0_21, %c0_22], %39 {strides = array<i32>} : memref<16x32xbf16, #tpu.memory_space<vmem>>, vector<16x32xbf16>,
    } else {
    }
    %c0 = arith.constant 0 : index
    %c0_1 = arith.constant 0 : index
    %3 = vector.load %arg9[%c0, %c0_1] : memref<16x32xf32, #tpu.memory_space<vmem>>, vector<16x32xf32>
    %4 = arith.truncf %3 : vector<16x32xf32> to vector<16x32xbf16>
    %c0_2 = arith.constant 0 : index
    %c0_3 = arith.constant 0 : index
    %5 = vector.load %arg5[%c0_2, %c0_3] : memref<32x96xbf16, #tpu.memory_space<vmem>>, vector<32x96xbf16>
    %cst = arith.constant dense<0.000000e+00> : vector<16x96xf32>
    %6 = tpu.matmul %4, %5, %cst {dimension_numbers = #tpu.dot_dimension_numbers<[1], [0], [0], [1], [0, 0, 1, 1], [], []>} : vector<16x32xbf16>, vector<32x96xbf16>, vector<16x96xf32> -> vector<16x96xf32>
    %c0_4 = arith.constant 0 : index
    %c0_5 = arith.constant 0 : index
    %7 = vector.load %arg6[%c0_4, %c0_5] : memref<1x96xf32, #tpu.memory_space<vmem>>, vector<1x96xf32>
    %8 = vector.broadcast %7 : vector<1x96xf32> to vector<16x96xf32>
    %9 = arith.addf %6, %8 : vector<16x96xf32>
    %10 = arith.truncf %9 : vector<16x96xf32> to vector<16x96xbf16>
    %c0_6 = arith.constant 0 : index
    %c0_7 = arith.constant 0 : index
    %11 = vector.load %arg8[%c0_6, %c0_7] : memref<16x96xbf16, #tpu.memory_space<vmem>>, vector<16x96xbf16>
    tpu.vector_store %arg8[%c0_6, %c0_7], %10 {strides = array<i32>} : memref<16x96xbf16, #tpu.memory_space<vmem>>, vector<16x96xbf16>,
    return
  }
  func.func @transform_0(%arg0: i32, %arg1: i32) -> (i32, i32) {
    %c0_i32 = arith.constant 0 : i32
    %c0_i32_0 = arith.constant 0 : i32
    return %arg0, %c0_i32 : i32, i32
  }
  func.func @transform_1(%arg0: i32, %arg1: i32) -> (i32, i32) {
    %c0_i32 = arith.constant 0 : i32
    %c0_i32_0 = arith.constant 0 : i32
    %c0_i32_1 = arith.constant 0 : i32
    return %c0_i32, %c0_i32_0 : i32, i32
  }
  func.func @transform_2(%arg0: i32, %arg1: i32) -> (i32, i32) {
    %c0_i32 = arith.constant 0 : i32
    %c0_i32_0 = arith.constant 0 : i32
    %c0_i32_1 = arith.constant 0 : i32
    return %c0_i32, %c0_i32_0 : i32, i32
  }
  func.func @transform_3(%arg0: i32, %arg1: i32) -> (i32, i32) {
    %c0_i32 = arith.constant 0 : i32
    %c0_i32_0 = arith.constant 0 : i32
    return %c0_i32, %arg1 : i32, i32
  }
  func.func @transform_4(%arg0: i32, %arg1: i32) -> (i32, i32) {
    %c0_i32 = arith.constant 0 : i32
    %c0_i32_0 = arith.constant 0 : i32
    return %c0_i32, %arg1 : i32, i32
  }
  func.func @transform_5(%arg0: i32, %arg1: i32) -> (i32, i32) {
    %c0_i32 = arith.constant 0 : i32
    %c0_i32_0 = arith.constant 0 : i32
    return %arg0, %c0_i32 : i32, i32
  }
  func.func @transform_6(%arg0: i32, %arg1: i32) -> (i32, i32) {
    %c0_i32 = arith.constant 0 : i32
    return %arg0, %arg1 : i32, i32
  }
}

module attributes {stable_mosaic.version = 11 : i64} {
  func.func @_flash_attn_kernel(%arg0: i32, %arg1: i32, %arg2: i32, %arg3: memref<1x4x8x8xbf16, #tpu.memory_space<vmem>>, %arg4: memref<1x4x8x8xbf16, #tpu.memory_space<vmem>>, %arg5: memref<1x4x8x8xbf16, #tpu.memory_space<vmem>>, %arg6: memref<1x8x32xbf16, #tpu.memory_space<vmem>>, %arg7: memref<4x8x32xbf16, #tpu.memory_space<vmem>>, %arg8: memref<1x32xf32, #tpu.memory_space<vmem>>, %arg9: memref<1x8x32xbf16, #tpu.memory_space<vmem>>, %arg10: memref<4x8x1xf32, #tpu.memory_space<vmem>>, %arg11: memref<4x8x1xf32, #tpu.memory_space<vmem>>, %arg12: memref<4x8x8xf32, #tpu.memory_space<vmem>>) attributes {dimension_semantics = [#tpu.dimension_semantics<parallel>, #tpu.dimension_semantics<parallel>, #tpu.dimension_semantics<arbitrary>], iteration_bounds = array<i64: 2, 1, 1>, scalar_prefetch = 0 : i64, scratch_operands = 3 : i64, tpu.core_type = #tpu.core_type<tc>, window_params = [{transform_indices = @transform_0, window_bounds = array<i64: 1, 4, 8, 8>}, {transform_indices = @transform_1, window_bounds = array<i64: 1, 4, 8, 8>}, {transform_indices = @transform_2, window_bounds = array<i64: 1, 4, 8, 8>}, {transform_indices = @transform_3, window_bounds = array<i64: 1, 8, 32>}, {pipeline_mode = #tpu.pipeline_mode<synchronous>, transform_indices = @transform_4, window_bounds = array<i64: 4, 8, 32>}, {pipeline_mode = #tpu.pipeline_mode<synchronous>, transform_indices = @transform_5, window_bounds = array<i64: 1, 32>}, {transform_indices = @transform_6, window_bounds = array<i64: 1, 8, 32>}]} {
    %c0_i32 = arith.constant 0 : i32
    %0 = arith.cmpi eq, %arg2, %c0_i32 : i32
    %1 = arith.extui %0 : i1 to i32
    %c0_i32_0 = arith.constant 0 : i32
    %2 = arith.cmpi ne, %1, %c0_i32_0 : i32
    scf.if %2 {
      %cst_35 = arith.constant 0xFF800000 : f32
      %36 = vector.broadcast %cst_35 : f32 to vector<4x8x1xf32>
      %c0_36 = arith.constant 0 : index
      %c0_37 = arith.constant 0 : index
      %c0_38 = arith.constant 0 : index
      %37 = vector.load %arg10[%c0_36, %c0_37, %c0_38] : memref<4x8x1xf32, #tpu.memory_space<vmem>>, vector<4x8x1xf32>
      tpu.vector_store %arg10[%c0_36, %c0_37, %c0_38], %36 {strides = array<i32>} : memref<4x8x1xf32, #tpu.memory_space<vmem>>, vector<4x8x1xf32>,
      %cst_39 = arith.constant 0.000000e+00 : f32
      %38 = vector.broadcast %cst_39 : f32 to vector<4x8x1xf32>
      %c0_40 = arith.constant 0 : index
      %c0_41 = arith.constant 0 : index
      %c0_42 = arith.constant 0 : index
      %39 = vector.load %arg11[%c0_40, %c0_41, %c0_42] : memref<4x8x1xf32, #tpu.memory_space<vmem>>, vector<4x8x1xf32>
      tpu.vector_store %arg11[%c0_40, %c0_41, %c0_42], %38 {strides = array<i32>} : memref<4x8x1xf32, #tpu.memory_space<vmem>>, vector<4x8x1xf32>,
      %cst_43 = arith.constant 0.000000e+00 : f32
      %40 = vector.broadcast %cst_43 : f32 to vector<4x8x8xf32>
      %c0_44 = arith.constant 0 : index
      %c0_45 = arith.constant 0 : index
      %c0_46 = arith.constant 0 : index
      %41 = vector.load %arg12[%c0_44, %c0_45, %c0_46] : memref<4x8x8xf32, #tpu.memory_space<vmem>>, vector<4x8x8xf32>
      tpu.vector_store %arg12[%c0_44, %c0_45, %c0_46], %40 {strides = array<i32>} : memref<4x8x8xf32, #tpu.memory_space<vmem>>, vector<4x8x8xf32>,
    } else {
    }
    %c0 = arith.constant 0 : index
    %c0_1 = arith.constant 0 : index
    %c0_2 = arith.constant 0 : index
    %c0_3 = arith.constant 0 : index
    %3 = vector.load %arg3[%c0, %c0_1, %c0_2, %c0_3] : memref<1x4x8x8xbf16, #tpu.memory_space<vmem>>, vector<1x4x8x8xbf16>
    %4 = vector.shape_cast %3 : vector<1x4x8x8xbf16> to vector<4x8x8xbf16>
    %c0_4 = arith.constant 0 : index
    %c0_5 = arith.constant 0 : index
    %c0_6 = arith.constant 0 : index
    %c0_7 = arith.constant 0 : index
    %5 = vector.load %arg4[%c0_4, %c0_5, %c0_6, %c0_7] : memref<1x4x8x8xbf16, #tpu.memory_space<vmem>>, vector<1x4x8x8xbf16>
    %6 = vector.shape_cast %5 : vector<1x4x8x8xbf16> to vector<4x8x8xbf16>
    "tpu.trace_start"() <{level = 10 : i32, message = "hqd,hkd->hqk"}> : () -> ()
    %cst = arith.constant dense<0.000000e+00> : vector<4x8x8xf32>
    %7 = tpu.matmul %4, %6, %cst {dimension_numbers = #tpu.dot_dimension_numbers<[2], [2], [1], [1], [0, 0, 0, 1, 1, 1], [0], [0]>} : vector<4x8x8xbf16>, vector<4x8x8xbf16>, vector<4x8x8xf32> -> vector<4x8x8xf32>
    "tpu.trace_stop"() : () -> ()
    %c0_8 = arith.constant 0 : index
    %c0_9 = arith.constant 0 : index
    %c0_10 = arith.constant 0 : index
    %8 = vector.load %arg10[%c0_8, %c0_9, %c0_10] : memref<4x8x1xf32, #tpu.memory_space<vmem>>, vector<4x8x1xf32>
    %cst_11 = arith.constant dense<0xFF800000> : vector<4x8xf32>
    %9 = vector.multi_reduction <maximumf>, %7, %cst_11 [2] : vector<4x8x8xf32> to vector<4x8xf32>
    %10 = vector.shape_cast %9 : vector<4x8xf32> to vector<4x8x1xf32>
    %11 = arith.maximumf %8, %10 : vector<4x8x1xf32>
    %12 = arith.subf %8, %11 : vector<4x8x1xf32>
    %13 = math.exp %12 : vector<4x8x1xf32>
    %14 = vector.broadcast %11 : vector<4x8x1xf32> to vector<4x8x8xf32>
    %15 = arith.subf %7, %14 : vector<4x8x8xf32>
    %16 = math.exp %15 : vector<4x8x8xf32>
    %c0_12 = arith.constant 0 : index
    %c0_13 = arith.constant 0 : index
    %c0_14 = arith.constant 0 : index
    %17 = vector.load %arg11[%c0_12, %c0_13, %c0_14] : memref<4x8x1xf32, #tpu.memory_space<vmem>>, vector<4x8x1xf32>
    %18 = arith.mulf %13, %17 : vector<4x8x1xf32>
    %cst_15 = arith.constant dense<0.000000e+00> : vector<4x8xf32>
    %19 = vector.multi_reduction <add>, %16, %cst_15 [2] : vector<4x8x8xf32> to vector<4x8xf32>
    %20 = vector.shape_cast %19 : vector<4x8xf32> to vector<4x8x1xf32>
    %21 = arith.addf %18, %20 : vector<4x8x1xf32>
    %c0_16 = arith.constant 0 : index
    %c0_17 = arith.constant 0 : index
    %c0_18 = arith.constant 0 : index
    %22 = vector.load %arg11[%c0_16, %c0_17, %c0_18] : memref<4x8x1xf32, #tpu.memory_space<vmem>>, vector<4x8x1xf32>
    tpu.vector_store %arg11[%c0_16, %c0_17, %c0_18], %21 {strides = array<i32>} : memref<4x8x1xf32, #tpu.memory_space<vmem>>, vector<4x8x1xf32>,
    %c0_19 = arith.constant 0 : index
    %c0_20 = arith.constant 0 : index
    %c0_21 = arith.constant 0 : index
    %23 = vector.load %arg12[%c0_19, %c0_20, %c0_21] : memref<4x8x8xf32, #tpu.memory_space<vmem>>, vector<4x8x8xf32>
    %24 = vector.broadcast %13 : vector<4x8x1xf32> to vector<4x8x8xf32>
    %25 = arith.mulf %24, %23 : vector<4x8x8xf32>
    %26 = arith.truncf %16 : vector<4x8x8xf32> to vector<4x8x8xbf16>
    %c0_22 = arith.constant 0 : index
    %c0_23 = arith.constant 0 : index
    %c0_24 = arith.constant 0 : index
    %c0_25 = arith.constant 0 : index
    %27 = vector.load %arg5[%c0_22, %c0_23, %c0_24, %c0_25] : memref<1x4x8x8xbf16, #tpu.memory_space<vmem>>, vector<1x4x8x8xbf16>
    %28 = vector.shape_cast %27 : vector<1x4x8x8xbf16> to vector<4x8x8xbf16>
    "tpu.trace_start"() <{level = 10 : i32, message = "hqk,hkd->hqd"}> : () -> ()
    %cst_26 = arith.constant dense<0.000000e+00> : vector<4x8x8xf32>
    %29 = tpu.matmul %26, %28, %cst_26 {dimension_numbers = #tpu.dot_dimension_numbers<[2], [1], [1], [2], [0, 0, 0, 1, 1, 2], [0], [0]>} : vector<4x8x8xbf16>, vector<4x8x8xbf16>, vector<4x8x8xf32> -> vector<4x8x8xf32>
    "tpu.trace_stop"() : () -> ()
    %30 = arith.addf %25, %29 : vector<4x8x8xf32>
    %c0_27 = arith.constant 0 : index
    %c0_28 = arith.constant 0 : index
    %c0_29 = arith.constant 0 : index
    %31 = vector.load %arg12[%c0_27, %c0_28, %c0_29] : memref<4x8x8xf32, #tpu.memory_space<vmem>>, vector<4x8x8xf32>
    tpu.vector_store %arg12[%c0_27, %c0_28, %c0_29], %30 {strides = array<i32>} : memref<4x8x8xf32, #tpu.memory_space<vmem>>, vector<4x8x8xf32>,
    %c0_30 = arith.constant 0 : index
    %c0_31 = arith.constant 0 : index
    %c0_32 = arith.constant 0 : index
    %32 = vector.load %arg10[%c0_30, %c0_31, %c0_32] : memref<4x8x1xf32, #tpu.memory_space<vmem>>, vector<4x8x1xf32>
    tpu.vector_store %arg10[%c0_30, %c0_31, %c0_32], %11 {strides = array<i32>} : memref<4x8x1xf32, #tpu.memory_space<vmem>>, vector<4x8x1xf32>,
    %c0_i32_33 = arith.constant 0 : i32
    %33 = arith.cmpi eq, %arg2, %c0_i32_33 : i32
    %34 = arith.extui %33 : i1 to i32
    %c0_i32_34 = arith.constant 0 : i32
    %35 = arith.cmpi ne, %34, %c0_i32_34 : i32
    scf.if %35 {
      %c0_35 = arith.constant 0 : index
      %c0_36 = arith.constant 0 : index
      %c0_37 = arith.constant 0 : index
      %36 = vector.load %arg11[%c0_35, %c0_36, %c0_37] : memref<4x8x1xf32, #tpu.memory_space<vmem>>, vector<4x8x1xf32>
      %37 = tpu.reciprocal %36 {approx = true} : vector<4x8x1xf32> -> vector<4x8x1xf32>
      %c0_38 = arith.constant 0 : index
      %c0_39 = arith.constant 0 : index
      %c0_40 = arith.constant 0 : index
      %38 = vector.load %arg12[%c0_38, %c0_39, %c0_40] : memref<4x8x8xf32, #tpu.memory_space<vmem>>, vector<4x8x8xf32>
      %39 = vector.broadcast %37 : vector<4x8x1xf32> to vector<4x8x8xf32>
      %40 = arith.mulf %38, %39 : vector<4x8x8xf32>
      %41 = arith.truncf %40 : vector<4x8x8xf32> to vector<4x8x8xbf16>
      %c0_41 = arith.constant 0 : index
      %c0_42 = arith.constant 0 : index
      %c0_43 = arith.constant 0 : index
      %42 = vector.load %arg6[%c0_41, %c0_42, %c0_43] : memref<1x8x32xbf16, #tpu.memory_space<vmem>>, vector<1x8x32xbf16>
      %43 = vector.shape_cast %42 : vector<1x8x32xbf16> to vector<8x32xbf16>
      %44 = arith.extf %43 : vector<8x32xbf16> to vector<8x32xf32>
      %c0_44 = arith.constant 0 : index
      %c0_45 = arith.constant 0 : index
      %45 = vector.load %arg8[%c0_44, %c0_45] : memref<1x32xf32, #tpu.memory_space<vmem>>, vector<1x32xf32>
      %46 = vector.broadcast %45 : vector<1x32xf32> to vector<8x32xf32>
      %47 = arith.addf %44, %46 : vector<8x32xf32>
      %48 = vector.extract_strided_slice %41 {offsets = [0, 0, 0], sizes = [1, 8, 8], strides = [1, 1, 1]} : vector<4x8x8xbf16> to vector<1x8x8xbf16>
      %49 = vector.shape_cast %48 : vector<1x8x8xbf16> to vector<8x8xbf16>
      %c0_46 = arith.constant 0 : index
      %c0_47 = arith.constant 0 : index
      %c0_48 = arith.constant 0 : index
      %50 = vector.load %arg7[%c0_46, %c0_47, %c0_48] : memref<4x8x32xbf16, #tpu.memory_space<vmem>>, vector<1x8x32xbf16>
      %51 = vector.shape_cast %50 : vector<1x8x32xbf16> to vector<8x32xbf16>
      %cst_49 = arith.constant dense<0.000000e+00> : vector<8x32xf32>
      %52 = tpu.matmul %49, %51, %cst_49 {dimension_numbers = #tpu.dot_dimension_numbers<[1], [0], [0], [1], [0, 0, 1, 1], [], []>} : vector<8x8xbf16>, vector<8x32xbf16>, vector<8x32xf32> -> vector<8x32xf32>
      %53 = arith.addf %47, %52 : vector<8x32xf32>
      %54 = vector.extract_strided_slice %41 {offsets = [1, 0, 0], sizes = [1, 8, 8], strides = [1, 1, 1]} : vector<4x8x8xbf16> to vector<1x8x8xbf16>
      %55 = vector.shape_cast %54 : vector<1x8x8xbf16> to vector<8x8xbf16>
      %c1 = arith.constant 1 : index
      %c0_50 = arith.constant 0 : index
      %c0_51 = arith.constant 0 : index
      %56 = vector.load %arg7[%c1, %c0_50, %c0_51] : memref<4x8x32xbf16, #tpu.memory_space<vmem>>, vector<1x8x32xbf16>
      %57 = vector.shape_cast %56 : vector<1x8x32xbf16> to vector<8x32xbf16>
      %cst_52 = arith.constant dense<0.000000e+00> : vector<8x32xf32>
      %58 = tpu.matmul %55, %57, %cst_52 {dimension_numbers = #tpu.dot_dimension_numbers<[1], [0], [0], [1], [0, 0, 1, 1], [], []>} : vector<8x8xbf16>, vector<8x32xbf16>, vector<8x32xf32> -> vector<8x32xf32>
      %59 = arith.addf %53, %58 : vector<8x32xf32>
      %60 = vector.extract_strided_slice %41 {offsets = [2, 0, 0], sizes = [1, 8, 8], strides = [1, 1, 1]} : vector<4x8x8xbf16> to vector<1x8x8xbf16>
      %61 = vector.shape_cast %60 : vector<1x8x8xbf16> to vector<8x8xbf16>
      %c2 = arith.constant 2 : index
      %c0_53 = arith.constant 0 : index
      %c0_54 = arith.constant 0 : index
      %62 = vector.load %arg7[%c2, %c0_53, %c0_54] : memref<4x8x32xbf16, #tpu.memory_space<vmem>>, vector<1x8x32xbf16>
      %63 = vector.shape_cast %62 : vector<1x8x32xbf16> to vector<8x32xbf16>
      %cst_55 = arith.constant dense<0.000000e+00> : vector<8x32xf32>
      %64 = tpu.matmul %61, %63, %cst_55 {dimension_numbers = #tpu.dot_dimension_numbers<[1], [0], [0], [1], [0, 0, 1, 1], [], []>} : vector<8x8xbf16>, vector<8x32xbf16>, vector<8x32xf32> -> vector<8x32xf32>
      %65 = arith.addf %59, %64 : vector<8x32xf32>
      %66 = vector.extract_strided_slice %41 {offsets = [3, 0, 0], sizes = [1, 8, 8], strides = [1, 1, 1]} : vector<4x8x8xbf16> to vector<1x8x8xbf16>
      %67 = vector.shape_cast %66 : vector<1x8x8xbf16> to vector<8x8xbf16>
      %c3 = arith.constant 3 : index
      %c0_56 = arith.constant 0 : index
      %c0_57 = arith.constant 0 : index
      %68 = vector.load %arg7[%c3, %c0_56, %c0_57] : memref<4x8x32xbf16, #tpu.memory_space<vmem>>, vector<1x8x32xbf16>
      %69 = vector.shape_cast %68 : vector<1x8x32xbf16> to vector<8x32xbf16>
      %cst_58 = arith.constant dense<0.000000e+00> : vector<8x32xf32>
      %70 = tpu.matmul %67, %69, %cst_58 {dimension_numbers = #tpu.dot_dimension_numbers<[1], [0], [0], [1], [0, 0, 1, 1], [], []>} : vector<8x8xbf16>, vector<8x32xbf16>, vector<8x32xf32> -> vector<8x32xf32>
      %71 = arith.addf %65, %70 : vector<8x32xf32>
      %72 = arith.truncf %71 : vector<8x32xf32> to vector<8x32xbf16>
      %c0_59 = arith.constant 0 : index
      %c0_60 = arith.constant 0 : index
      %c0_61 = arith.constant 0 : index
      %73 = vector.load %arg9[%c0_59, %c0_60, %c0_61] : memref<1x8x32xbf16, #tpu.memory_space<vmem>>, vector<1x8x32xbf16>
      %74 = vector.shape_cast %73 : vector<1x8x32xbf16> to vector<8x32xbf16>
      %75 = vector.shape_cast %72 : vector<8x32xbf16> to vector<1x8x32xbf16>
      tpu.vector_store %arg9[%c0_59, %c0_60, %c0_61], %75 {strides = array<i32>} : memref<1x8x32xbf16, #tpu.memory_space<vmem>>, vector<1x8x32xbf16>,
    } else {
    }
    return
  }
  func.func @transform_0(%arg0: i32, %arg1: i32, %arg2: i32) -> (i32, i32, i32, i32) {
    %c0_i32 = arith.constant 0 : i32
    %c0_i32_0 = arith.constant 0 : i32
    %c0_i32_1 = arith.constant 0 : i32
    return %arg0, %c0_i32, %arg1, %c0_i32_0 : i32, i32, i32, i32
  }
  func.func @transform_1(%arg0: i32, %arg1: i32, %arg2: i32) -> (i32, i32, i32, i32) {
    %c0_i32 = arith.constant 0 : i32
    %c0_i32_0 = arith.constant 0 : i32
    %c0_i32_1 = arith.constant 0 : i32
    return %arg0, %c0_i32, %arg2, %c0_i32_0 : i32, i32, i32, i32
  }
  func.func @transform_2(%arg0: i32, %arg1: i32, %arg2: i32) -> (i32, i32, i32, i32) {
    %c0_i32 = arith.constant 0 : i32
    %c0_i32_0 = arith.constant 0 : i32
    %c0_i32_1 = arith.constant 0 : i32
    return %arg0, %c0_i32, %arg2, %c0_i32_0 : i32, i32, i32, i32
  }
  func.func @transform_3(%arg0: i32, %arg1: i32, %arg2: i32) -> (i32, i32, i32) {
    %c0_i32 = arith.constant 0 : i32
    %c0_i32_0 = arith.constant 0 : i32
    return %arg0, %arg1, %c0_i32 : i32, i32, i32
  }
  func.func @transform_4(%arg0: i32, %arg1: i32, %arg2: i32) -> (i32, i32, i32) {
    %c0_i32 = arith.constant 0 : i32
    %c0_i32_0 = arith.constant 0 : i32
    %c0_i32_1 = arith.constant 0 : i32
    %c0_i32_2 = arith.constant 0 : i32
    return %c0_i32, %c0_i32_0, %c0_i32_1 : i32, i32, i32
  }
  func.func @transform_5(%arg0: i32, %arg1: i32, %arg2: i32) -> (i32, i32) {
    %c0_i32 = arith.constant 0 : i32
    %c0_i32_0 = arith.constant 0 : i32
    %c0_i32_1 = arith.constant 0 : i32
    return %c0_i32, %c0_i32_0 : i32, i32
  }
  func.func @transform_6(%arg0: i32, %arg1: i32, %arg2: i32) -> (i32, i32, i32) {
    %c0_i32 = arith.constant 0 : i32
    %c0_i32_0 = arith.constant 0 : i32
    return %arg0, %arg1, %c0_i32 : i32, i32, i32
  }
}

module attributes {stable_mosaic.version = 11 : i64} {
  func.func @_ffn_kernel(%arg0: i32, %arg1: i32, %arg2: memref<16x32xbf16, #tpu.memory_space<vmem>>, %arg3: memref<1x32xf32, #tpu.memory_space<vmem>>, %arg4: memref<1x32xf32, #tpu.memory_space<vmem>>, %arg5: memref<32x64xbf16, #tpu.memory_space<vmem>>, %arg6: memref<1x64xf32, #tpu.memory_space<vmem>>, %arg7: memref<64x32xbf16, #tpu.memory_space<vmem>>, %arg8: memref<1x32xf32, #tpu.memory_space<vmem>>, %arg9: memref<16x32xbf16, #tpu.memory_space<vmem>>, %arg10: memref<16x32xf32, #tpu.memory_space<vmem>>, %arg11: memref<16x32xf32, #tpu.memory_space<vmem>>) attributes {dimension_semantics = [#tpu.dimension_semantics<parallel>, #tpu.dimension_semantics<arbitrary>], iteration_bounds = array<i64: 1, 1>, scalar_prefetch = 0 : i64, scratch_operands = 2 : i64, tpu.core_type = #tpu.core_type<tc>, window_params = [{transform_indices = @transform_0, window_bounds = array<i64: 16, 32>}, {pipeline_mode = #tpu.pipeline_mode<synchronous>, transform_indices = @transform_1, window_bounds = array<i64: 1, 32>}, {pipeline_mode = #tpu.pipeline_mode<synchronous>, transform_indices = @transform_2, window_bounds = array<i64: 1, 32>}, {transform_indices = @transform_3, window_bounds = array<i64: 32, 64>}, {transform_indices = @transform_4, window_bounds = array<i64: 1, 64>}, {transform_indices = @transform_5, window_bounds = array<i64: 64, 32>}, {pipeline_mode = #tpu.pipeline_mode<synchronous>, transform_indices = @transform_6, window_bounds = array<i64: 1, 32>}, {transform_indices = @transform_7, window_bounds = array<i64: 16, 32>}]} {
    %c0_i32 = arith.constant 0 : i32
    %0 = arith.cmpi eq, %arg1, %c0_i32 : i32
    %1 = arith.extui %0 : i1 to i32
    %c0_i32_0 = arith.constant 0 : i32
    %2 = arith.cmpi ne, %1, %c0_i32_0 : i32
    scf.if %2 {
      %c0_16 = arith.constant 0 : index
      %c0_17 = arith.constant 0 : index
      %21 = vector.load %arg2[%c0_16, %c0_17] : memref<16x32xbf16, #tpu.memory_space<vmem>>, vector<16x32xbf16>
      %22 = arith.extf %21 : vector<16x32xbf16> to vector<16x32xf32>
      %cst_18 = arith.constant dense<0.000000e+00> : vector<16xf32>
      %23 = vector.multi_reduction <add>, %22, %cst_18 [1] : vector<16x32xf32> to vector<16xf32>
      %24 = vector.shape_cast %23 : vector<16xf32> to vector<16x1xf32>
      %cst_19 = arith.constant 3.200000e+01 : f32
      %25 = vector.broadcast %cst_19 : f32 to vector<16x1xf32>
      %26 = arith.divf %24, %25 : vector<16x1xf32>
      %27 = vector.broadcast %26 : vector<16x1xf32> to vector<16x32xf32>
      %28 = arith.subf %22, %27 : vector<16x32xf32>
      %29 = arith.mulf %28, %28 : vector<16x32xf32>
      %cst_20 = arith.constant dense<0.000000e+00> : vector<16xf32>
      %30 = vector.multi_reduction <add>, %29, %cst_20 [1] : vector<16x32xf32> to vector<16xf32>
      %31 = vector.shape_cast %30 : vector<16xf32> to vector<16x1xf32>
      %cst_21 = arith.constant 3.200000e+01 : f32
      %32 = vector.broadcast %cst_21 : f32 to vector<16x1xf32>
      %33 = arith.divf %31, %32 : vector<16x1xf32>
      %34 = vector.broadcast %26 : vector<16x1xf32> to vector<16x32xf32>
      %35 = arith.subf %22, %34 : vector<16x32xf32>
      %cst_22 = arith.constant 9.99999996E-13 : f32
      %36 = vector.broadcast %cst_22 : f32 to vector<16x1xf32>
      %37 = arith.addf %33, %36 : vector<16x1xf32>
      %38 = math.rsqrt %37 : vector<16x1xf32>
      %39 = vector.broadcast %38 : vector<16x1xf32> to vector<16x32xf32>
      %40 = arith.mulf %35, %39 : vector<16x32xf32>
      %c0_23 = arith.constant 0 : index
      %c0_24 = arith.constant 0 : index
      %41 = vector.load %arg3[%c0_23, %c0_24] : memref<1x32xf32, #tpu.memory_space<vmem>>, vector<1x32xf32>
      %42 = vector.broadcast %41 : vector<1x32xf32> to vector<16x32xf32>
      %43 = arith.mulf %40, %42 : vector<16x32xf32>
      %c0_25 = arith.constant 0 : index
      %c0_26 = arith.constant 0 : index
      %44 = vector.load %arg4[%c0_25, %c0_26] : memref<1x32xf32, #tpu.memory_space<vmem>>, vector<1x32xf32>
      %45 = vector.broadcast %44 : vector<1x32xf32> to vector<16x32xf32>
      %46 = arith.addf %43, %45 : vector<16x32xf32>
      %c0_27 = arith.constant 0 : index
      %c0_28 = arith.constant 0 : index
      %47 = vector.load %arg10[%c0_27, %c0_28] : memref<16x32xf32, #tpu.memory_space<vmem>>, vector<16x32xf32>
      tpu.vector_store %arg10[%c0_27, %c0_28], %46 {strides = array<i32>} : memref<16x32xf32, #tpu.memory_space<vmem>>, vector<16x32xf32>,
      %cst_29 = arith.constant 0.000000e+00 : f32
      %48 = vector.broadcast %cst_29 : f32 to vector<16x32xf32>
      %c0_30 = arith.constant 0 : index
      %c0_31 = arith.constant 0 : index
      %49 = vector.load %arg11[%c0_30, %c0_31] : memref<16x32xf32, #tpu.memory_space<vmem>>, vector<16x32xf32>
      tpu.vector_store %arg11[%c0_30, %c0_31], %48 {strides = array<i32>} : memref<16x32xf32, #tpu.memory_space<vmem>>, vector<16x32xf32>,
    } else {
    }
    %c0 = arith.constant 0 : index
    %c0_1 = arith.constant 0 : index
    %3 = vector.load %arg10[%c0, %c0_1] : memref<16x32xf32, #tpu.memory_space<vmem>>, vector<16x32xf32>
    %4 = arith.truncf %3 : vector<16x32xf32> to vector<16x32xbf16>
    %c0_2 = arith.constant 0 : index
    %c0_3 = arith.constant 0 : index
    %5 = vector.load %arg5[%c0_2, %c0_3] : memref<32x64xbf16, #tpu.memory_space<vmem>>, vector<32x64xbf16>
    %cst = arith.constant dense<0.000000e+00> : vector<16x64xf32>
    %6 = tpu.matmul %4, %5, %cst {dimension_numbers = #tpu.dot_dimension_numbers<[1], [0], [0], [1], [0, 0, 1, 1], [], []>} : vector<16x32xbf16>, vector<32x64xbf16>, vector<16x64xf32> -> vector<16x64xf32>
    %c0_4 = arith.constant 0 : index
    %c0_5 = arith.constant 0 : index
    %7 = vector.load %arg6[%c0_4, %c0_5] : memref<1x64xf32, #tpu.memory_space<vmem>>, vector<1x64xf32>
    %8 = vector.broadcast %7 : vector<1x64xf32> to vector<16x64xf32>
    %9 = arith.addf %6, %8 : vector<16x64xf32>
    %cst_6 = arith.constant 0.000000e+00 : f32
    %10 = vector.broadcast %cst_6 : f32 to vector<16x64xf32>
    %11 = arith.maximumf %9, %10 : vector<16x64xf32>
    %c0_7 = arith.constant 0 : index
    %c0_8 = arith.constant 0 : index
    %12 = vector.load %arg11[%c0_7, %c0_8] : memref<16x32xf32, #tpu.memory_space<vmem>>, vector<16x32xf32>
    %13 = arith.truncf %11 : vector<16x64xf32> to vector<16x64xbf16>
    %c0_9 = arith.constant 0 : index
    %c0_10 = arith.constant 0 : index
    %14 = vector.load %arg7[%c0_9, %c0_10] : memref<64x32xbf16, #tpu.memory_space<vmem>>, vector<64x32xbf16>
    %cst_11 = arith.constant dense<0.000000e+00> : vector<16x32xf32>
    %15 = tpu.matmul %13, %14, %cst_11 {dimension_numbers = #tpu.dot_dimension_numbers<[1], [0], [0], [1], [0, 0, 1, 1], [], []>} : vector<16x64xbf16>, vector<64x32xbf16>, vector<16x32xf32> -> vector<16x32xf32>
    %16 = arith.addf %12, %15 : vector<16x32xf32>
    %c0_12 = arith.constant 0 : index
    %c0_13 = arith.constant 0 : index
    %17 = vector.load %arg11[%c0_12, %c0_13] : memref<16x32xf32, #tpu.memory_space<vmem>>, vector<16x32xf32>
    tpu.vector_store %arg11[%c0_12, %c0_13], %16 {strides = array<i32>} : memref<16x32xf32, #tpu.memory_space<vmem>>, vector<16x32xf32>,
    %c0_i32_14 = arith.constant 0 : i32
    %18 = arith.cmpi eq, %arg1, %c0_i32_14 : i32
    %19 = arith.extui %18 : i1 to i32
    %c0_i32_15 = arith.constant 0 : i32
    %20 = arith.cmpi ne, %19, %c0_i32_15 : i32
    scf.if %20 {
      %c0_16 = arith.constant 0 : index
      %c0_17 = arith.constant 0 : index
      %21 = vector.load %arg11[%c0_16, %c0_17] : memref<16x32xf32, #tpu.memory_space<vmem>>, vector<16x32xf32>
      %c0_18 = arith.constant 0 : index
      %c0_19 = arith.constant 0 : index
      %22 = vector.load %arg8[%c0_18, %c0_19] : memref<1x32xf32, #tpu.memory_space<vmem>>, vector<1x32xf32>
      %23 = vector.broadcast %22 : vector<1x32xf32> to vector<16x32xf32>
      %24 = arith.addf %21, %23 : vector<16x32xf32>
      %c0_20 = arith.constant 0 : index
      %c0_21 = arith.constant 0 : index
      %25 = vector.load %arg10[%c0_20, %c0_21] : memref<16x32xf32, #tpu.memory_space<vmem>>, vector<16x32xf32>
      %26 = arith.addf %24, %25 : vector<16x32xf32>
      %27 = arith.truncf %26 : vector<16x32xf32> to vector<16x32xbf16>
      %c0_22 = arith.constant 0 : index
      %c0_23 = arith.constant 0 : index
      %28 = vector.load %arg9[%c0_22, %c0_23] : memref<16x32xbf16, #tpu.memory_space<vmem>>, vector<16x32xbf16>
      tpu.vector_store %arg9[%c0_22, %c0_23], %27 {strides = array<i32>} : memref<16x32xbf16, #tpu.memory_space<vmem>>, vector<16x32xbf16>,
    } else {
    }
    return
  }
  func.func @transform_0(%arg0: i32, %arg1: i32) -> (i32, i32) {
    %c0_i32 = arith.constant 0 : i32
    %c0_i32_0 = arith.constant 0 : i32
    return %arg0, %c0_i32 : i32, i32
  }
  func.func @transform_1(%arg0: i32, %arg1: i32) -> (i32, i32) {
    %c0_i32 = arith.constant 0 : i32
    %c0_i32_0 = arith.constant 0 : i32
    %c0_i32_1 = arith.constant 0 : i32
    return %c0_i32, %c0_i32_0 : i32, i32
  }
  func.func @transform_2(%arg0: i32, %arg1: i32) -> (i32, i32) {
    %c0_i32 = arith.constant 0 : i32
    %c0_i32_0 = arith.constant 0 : i32
    %c0_i32_1 = arith.constant 0 : i32
    return %c0_i32, %c0_i32_0 : i32, i32
  }
  func.func @transform_3(%arg0: i32, %arg1: i32) -> (i32, i32) {
    %c0_i32 = arith.constant 0 : i32
    %c0_i32_0 = arith.constant 0 : i32
    return %c0_i32, %arg1 : i32, i32
  }
  func.func @transform_4(%arg0: i32, %arg1: i32) -> (i32, i32) {
    %c0_i32 = arith.constant 0 : i32
    %c0_i32_0 = arith.constant 0 : i32
    return %c0_i32, %arg1 : i32, i32
  }
  func.func @transform_5(%arg0: i32, %arg1: i32) -> (i32, i32) {
    %c0_i32 = arith.constant 0 : i32
    %c0_i32_0 = arith.constant 0 : i32
    return %arg1, %c0_i32 : i32, i32
  }
  func.func @transform_6(%arg0: i32, %arg1: i32) -> (i32, i32) {
    %c0_i32 = arith.constant 0 : i32
    %c0_i32_0 = arith.constant 0 : i32
    %c0_i32_1 = arith.constant 0 : i32
    return %c0_i32, %c0_i32_0 : i32, i32
  }
  func.func @transform_7(%arg0: i32, %arg1: i32) -> (i32, i32) {
    %c0_i32 = arith.constant 0 : i32
    %c0_i32_0 = arith.constant 0 : i32
    return %arg0, %c0_i32 : i32, i32
  }
}

</mosaic_0001>

<bundles_post_ra>
// kernel: transformer_forward.6
= control target key start
LH: loop header
LB: loop body
LE: loop exit
PB: predicated region body
PF: predicated region fallthrough
CT: control target
= control target key end

     0   :  { %vm31_vm0 = vcmask 261120   ;;  %v217_v16 = vmov 0.0   ;;  %vm218_vm1 = vmmov 0   ;;  %vm87_vm2 = vcmask 257024   ;;  %s291_s0 = inlined_call_operand.vmem [shape: bf16[16,32], index: 0, kind: input, shape index: {}]   ;;  %s292_s3 = inlined_call_operand.vmem [shape: bf16[32,96], index: 3, kind: input, shape index: {}]   ;;  %s293_s1 = inlined_call_operand.vmem [shape: f32[1,32], index: 1, kind: input, shape index: {}]   ;;  %s294_s2 = inlined_call_operand.vmem [shape: f32[1,32], index: 2, kind: input, shape index: {}]   ;;  %s295_s5 = inlined_call_operand.vmem [shape: bf16[16,32], index: 5, kind: output, shape index: {0}]   ;;  %s296_s4 = inlined_call_operand.vmem [shape: f32[1,96], index: 4, kind: input, shape index: {}]   ;;  %s297_s6 = inlined_call_operand.vmem [shape: bf16[16,96], index: 6, kind: output, shape index: {1}]  }
   0x1   :  { %v195_v0 = vld [vmem:[%s291_s0] sm:$0xff]   ;;  %v211_v15 = vld [vmem:[%s292_s3 + $0x8] sm:$0xff]   ;;  %201 = vmatprep.subr.bf16.mxu0 %v217_v16  ;;  %205 = vmatprep.mubr.msk.bf16.mxu0 %vm218_vm1, %v217_v16  ;;  %vm169_vm3 = vcmask 781312  }
   0x2   :  { %v196_v1 = vunpack.c.l.bf16 %v195_v0  ;;  %v197_v2 = vunpack.c.h.bf16 %v195_v0  ;;  %202 = vmatpush3.bf16.msra.mxu0 %v211_v15  ;;  %v212_v17 = vld [vmem:[%s292_s3] sm:$0xff]  }
   0x3   :  { %203 = vmatprep.subr.bf16.mxu0 %v217_v16  ;;  %v180_v25 = vld [vmem:[%s293_s1] ss:$0 sm:$0xff] }
   0x4   :  { %v32_v3 = vsel %vm31_vm0, %v196_v1, 0.0  ;;  %v35_v4 = vsel %vm31_vm0, %v197_v2, 0.0  ;;  %v181_v27 = vld [vmem:[%s294_s2] ss:$0 sm:$0xff] }
   0x5   :  { %33 = vadd.xlane.f32.xlu0 %v32_v3  ;;  %v184_v39 = vld [vmem:[%s296_s4] ss:$0 sm:$0xff] }
   0x6   :  { %204 = vmatpush3.bf16.msra.mxu0 %v212_v17 }
   0x9   :  { %36 = vadd.xlane.f32.xlu0 %v35_v4 }
  0x8e   :  { %v34_v5 = vpop.xlane.xlu0 %33 }
  0x8f   :  { %v39_v6 = vmul.f32 0.03125, %v34_v5 }
  0x91   :  { %v41_v7 = vsub.f32 %v196_v1, %v39_v6 }
  0x92   :  { %v37_v8 = vpop.xlane.xlu0 %36 }
  0x93   :  { %v40_v9 = vmul.f32 0.03125, %v37_v8  ;;  %v43_v10 = vmul.f32 %v41_v7, %v41_v7 }
  0x95   :  { %v42_v11 = vsub.f32 %v197_v2, %v40_v9  ;;  %v45_v12 = vsel %vm31_vm0, %v43_v10, 0.0 }
  0x96   :  { %46 = vadd.xlane.f32.xlu1 %v45_v12 }
  0x97   :  { %v44_v13 = vmul.f32 %v42_v11, %v42_v11 }
  0x99   :  { %v48_v14 = vsel %vm31_vm0, %v44_v13, 0.0 }
  0x9a   :  { %49 = vadd.xlane.f32.xlu1 %v48_v14 }
 0x11f   :  { %v47_v18 = vpop.xlane.xlu1 %46 }
 0x120   :  { %v51_v19 = vmul.f32 0.03125, %v47_v18 }
 0x122   :  { %v53_v20 = vadd.f32 1e-12, %v51_v19 }
 0x123   :  { %v50_v21 = vpop.xlane.xlu1 %49 }
 0x124   :  { %213 = vrsqrt.f32 %v53_v20  ;;  %v52_v22 = vmul.f32 0.03125, %v50_v21 }
 0x126   :  { %v54_v23 = vadd.f32 1e-12, %v52_v22 }
 0x128   :  { %215 = vrsqrt.f32 %v54_v23 }
 0x131   :  { %v214_v24 = vpop.eup %213 }
 0x132   :  { %v57_v26 = vmul.f32 %v214_v24, %v41_v7 }
 0x134   :  { %v66_v28 = vmul.f32 %v180_v25, %v57_v26 }
 0x135   :  { %v216_v29 = vpop.eup %215 }
 0x136   :  { %v75_v30 = vadd.f32 %v181_v27, %v66_v28  ;;  %v58_v31 = vmul.f32 %v216_v29, %v42_v11 }
 0x138   :  { %77 = vst.msk [vmem:[#allocation2] sm:$0xff] %vm31_vm0, %v75_v30  ;;  %v190_v32 = vpack.c.bf16 %v75_v30, %v75_v30  ;;  %v67_v33 = vmul.f32 %v180_v25, %v58_v31 }
 0x13a   :  { %88 = vst.msk [vmem:[%s295_s5] sm:$0xf] %vm87_vm2, %v190_v32  ;;  %v76_v34 = vadd.f32 %v181_v27, %v67_v33 }
 0x13c   :  { %78 = vst.msk [vmem:[#allocation2 + $0x8] sm:$0xff] %vm31_vm0, %v76_v34  ;;  %v191_v35 = vpack.c.bf16 %v76_v34, %v76_v34 }
 0x13e   :  { %89 = vst.msk [vmem:[%s295_s5 + $0x4] sm:$0xf] %vm87_vm2, %v191_v35 }
 0x13f   :  { %v90_v36 = vld [vmem:[#allocation2] sm:$0xff] }
 0x143   :  { %v91_v37 = vld [vmem:[#allocation2 + $0x8] sm:$0xff] }
 0x144   :  { %v92_v38 = vpack.c.bf16 %v91_v37, %v90_v36 }
 0x146   :  { %206 = vmatmul.mubr.msk.bf16.vlgmr.msra.gmra.mxu0 %vm31_vm0, %v92_v38 }
 0x206   :  { %v154_v40 = vpop.f32.mrf.mxu0 }
 0x207   :  { %v155_v41 = vadd.f32 %v184_v39, %v154_v40 }
 0x208   :  { %v207_v42 = vpop.f32.mrf.mxu0 }
 0x209   :  { %v192_v43 = vpack.c.bf16 %v155_v41, %v155_v41 }
 0x20a   :  { %v157_v44 = vpop.f32.mrf.mxu0 }
 0x20b   :  { %170 = vst.msk [vmem:[%s297_s6] sm:$0xf] %vm169_vm3, %v192_v43  ;;  %v158_v45 = vadd.f32 %v184_v39, %v157_v44 }
 0x20c   :  { %v208_v46 = vpop.f32.mrf.mxu0 }
 0x20d   :  { %v193_v47 = vpack.c.bf16 %v158_v45, %v158_v45 }
 0x20f   :  { %171 = vst.msk [vmem:[%s297_s6 + $0x4] sm:$0xf] %vm169_vm3, %v193_v47 }

// kernel: transformer_forward.8
= control target key start
LH: loop header
LB: loop body
LE: loop exit
PB: predicated region body
PF: predicated region fallthrough
CT: control target
= control target key end

     0   :  { %vm35_vm0 = vcmask 261120   ;;  %v335_v15 = vmov 0.0   ;;  %vm336_vm1 = vmmov 0   ;;  %vm193_vm2 = vcmask 523264   ;;  %s427_s0 = inlined_call_operand.vmem [shape: bf16[16,32], index: 0, kind: input, shape index: {}]   ;;  %s428_s3 = inlined_call_operand.vmem [shape: bf16[32,64], index: 3, kind: input, shape index: {}]   ;;  %s429_s5 = inlined_call_operand.vmem [shape: bf16[64,32], index: 5, kind: input, shape index: {}]   ;;  %s430_s1 = inlined_call_operand.vmem [shape: f32[1,32], index: 1, kind: input, shape index: {}]   ;;  %s431_s2 = inlined_call_operand.vmem [shape: f32[1,32], index: 2, kind: input, shape index: {}]   ;;  %s432_s4 = inlined_call_operand.vmem [shape: f32[1,64], index: 4, kind: input, shape index: {}]   ;;  %s433_s6 = inlined_call_operand.vmem [shape: f32[1,32], index: 6, kind: input, shape index: {}]   ;;  %s434_s7 = inlined_call_operand.vmem [shape: bf16[16,32], index: 7, kind: output, shape index: {}]  }
   0x1   :  { %v292_v0 = vld [vmem:[%s427_s0] sm:$0xff]   ;;  %303 = vmatprep.subr.bf16.mxu0 %v335_v15  ;;  %83 = vst.msk [vmem:[#allocation3] sm:$0xff] %vm35_vm0, %v335_v15  ;;  %84 = vst.msk [vmem:[#allocation3 + $0x8] sm:$0xff] %vm35_vm0, %v335_v15  ;;  %v325_v16 = vld [vmem:[%s428_s3 + $0x8] sm:$0xff]   ;;  %307 = vmatprep.mubr.msk.bf16.mxu0 %vm336_vm1, %v335_v15  ;;  %vm268_vm3 = vcmask 257024  }
   0x2   :  { %v293_v1 = vunpack.c.l.bf16 %v292_v0  ;;  %v294_v2 = vunpack.c.h.bf16 %v292_v0  ;;  %311 = vmatprep.subr.bf16.mxu1 %v335_v15  ;;  %319 = vmatprep.mubr.msk.bf16.mxu1 %vm336_vm1, %v335_v15  ;;  %v326_v17 = vld [vmem:[%s428_s3] sm:$0xff]   ;;  %v327_v18 = vld [vmem:[%s429_s5 + $0x18] sm:$0xff]   ;;  %v328_v38 = vld [vmem:[%s429_s5 + $0x10] sm:$0xff]  }
   0x3   :  { %304 = vmatpush3.bf16.msra.mxu0 %v325_v16  ;;  %312 = vmatpush3.bf16.msra.mxu1 %v327_v18  ;;  %v275_v26 = vld [vmem:[%s430_s1] ss:$0 sm:$0xff]  ;;  %v329_v39 = vld [vmem:[%s429_s5 + $0x8] sm:$0xff]  }
   0x4   :  { %v36_v3 = vsel %vm35_vm0, %v293_v1, 0.0  ;;  %v39_v4 = vsel %vm35_vm0, %v294_v2, 0.0  ;;  %305 = vmatprep.subr.bf16.mxu0 %v335_v15  ;;  %313 = vmatprep.subr.bf16.mxu1 %v335_v15  ;;  %v276_v28 = vld [vmem:[%s431_s2] ss:$0 sm:$0xff] }
   0x5   :  { %37 = vadd.xlane.f32.xlu0 %v36_v3  ;;  %v330_v40 = vld [vmem:[%s429_s5] sm:$0xff]  }
   0x6   :  { %v277_v41 = vld [vmem:[%s432_s4] ss:$0 sm:$0xff] }
   0x7   :  { %306 = vmatpush3.bf16.msra.mxu0 %v326_v17  ;;  %314 = vmatpush3.bf16.msra.mxu1 %v328_v38  ;;  %v286_v59 = vld [vmem:[%s433_s6] ss:$0 sm:$0xff] }
   0x8   :  { %315 = vmatprep.subr.bf16.mxu1 %v335_v15  ;;  %v158_v51 = vld [vmem:[#allocation3] sm:$0xff]  ;;  %v159_v55 = vld [vmem:[#allocation3 + $0x8] sm:$0xff] }
   0x9   :  { %40 = vadd.xlane.f32.xlu0 %v39_v4 }
   0xb   :  { %316 = vmatpush3.bf16.msra.mxu1 %v329_v39 }
   0xc   :  { %317 = vmatprep.subr.bf16.mxu1 %v335_v15 }
   0xf   :  { %318 = vmatpush3.bf16.msra.mxu1 %v330_v40 }
  0x8e   :  { %v38_v5 = vpop.xlane.xlu0 %37 }
  0x8f   :  { %v43_v6 = vmul.f32 0.03125, %v38_v5 }
  0x91   :  { %v45_v7 = vsub.f32 %v293_v1, %v43_v6 }
  0x92   :  { %v41_v8 = vpop.xlane.xlu0 %40 }
  0x93   :  { %v44_v9 = vmul.f32 0.03125, %v41_v8  ;;  %v47_v10 = vmul.f32 %v45_v7, %v45_v7 }
  0x95   :  { %v46_v11 = vsub.f32 %v294_v2, %v44_v9  ;;  %v49_v12 = vsel %vm35_vm0, %v47_v10, 0.0 }
  0x96   :  { %50 = vadd.xlane.f32.xlu1 %v49_v12 }
  0x97   :  { %v48_v13 = vmul.f32 %v46_v11, %v46_v11 }
  0x99   :  { %v52_v14 = vsel %vm35_vm0, %v48_v13, 0.0 }
  0x9a   :  { %53 = vadd.xlane.f32.xlu1 %v52_v14 }
 0x11f   :  { %v51_v19 = vpop.xlane.xlu1 %50 }
 0x120   :  { %v55_v20 = vmul.f32 0.03125, %v51_v19 }
 0x122   :  { %v57_v21 = vadd.f32 1e-12, %v55_v20 }
 0x123   :  { %v54_v22 = vpop.xlane.xlu1 %53 }
 0x124   :  { %331 = vrsqrt.f32 %v57_v21  ;;  %v56_v23 = vmul.f32 0.03125, %v54_v22 }
 0x126   :  { %v58_v24 = vadd.f32 1e-12, %v56_v23 }
 0x128   :  { %333 = vrsqrt.f32 %v58_v24 }
 0x131   :  { %v332_v25 = vpop.eup %331 }
 0x132   :  { %v61_v27 = vmul.f32 %v332_v25, %v45_v7 }
 0x134   :  { %v70_v29 = vmul.f32 %v275_v26, %v61_v27 }
 0x135   :  { %v334_v30 = vpop.eup %333 }
 0x136   :  { %v79_v31 = vadd.f32 %v276_v28, %v70_v29  ;;  %v62_v32 = vmul.f32 %v334_v30, %v46_v11 }
 0x138   :  { %81 = vst.msk [vmem:[#allocation2] sm:$0xff] %vm35_vm0, %v79_v31  ;;  %v71_v33 = vmul.f32 %v275_v26, %v62_v32 }
 0x13a   :  { %v80_v34 = vadd.f32 %v276_v28, %v71_v33 }
 0x13c   :  { %82 = vst.msk [vmem:[#allocation2 + $0x8] sm:$0xff] %vm35_vm0, %v80_v34 }
 0x13f   :  { %v85_v35 = vld [vmem:[#allocation2] sm:$0xff] }
 0x143   :  { %v86_v36 = vld [vmem:[#allocation2 + $0x8] sm:$0xff] }
 0x144   :  { %v87_v37 = vpack.c.bf16 %v86_v36, %v85_v35 }
 0x146   :  { %308 = vmatmul.mubr.msk.bf16.vlgmr.msra.gmra.mxu0 %vm35_vm0, %v87_v37 }
 0x206   :  { %v149_v42 = vpop.f32.mrf.mxu0 }
 0x207   :  { %v150_v44 = vadd.f32 %v277_v41, %v149_v42 }
 0x208   :  { %v309_v43 = vpop.f32.mrf.mxu0 }
 0x209   :  { %v156_v48 = vmax.f32 %v150_v44, 0.0 }
 0x20a   :  { %v152_v45 = vpop.f32.mrf.mxu0 }
 0x20b   :  { %v153_v46 = vadd.f32 %v277_v41, %v152_v45 }
 0x20c   :  { %v310_v47 = vpop.f32.mrf.mxu0 }
 0x20d   :  { %v157_v49 = vmax.f32 %v153_v46, 0.0 }
 0x20f   :  { %v160_v50 = vpack.c.bf16 %v157_v49, %v156_v48 }
 0x211   :  { %320 = vmatmul.mubr.msk.bf16.vlgmr.msra.gmra.mxu1 %vm193_vm2, %v160_v50 }
 0x2d1   :  { %v231_v52 = vpop.f32.mrf.mxu1 }
 0x2d2   :  { %v238_v53 = vadd.f32 %v231_v52, %v158_v51 }
 0x2d3   :  { %v321_v54 = vpop.f32.mrf.mxu1 }
 0x2d4   :  { %240 = vst.msk [vmem:[#allocation3] sm:$0xff] %vm35_vm0, %v238_v53 }
 0x2d5   :  { %v234_v56 = vpop.f32.mrf.mxu1 }
 0x2d6   :  { %v239_v57 = vadd.f32 %v234_v56, %v159_v55 }
 0x2d7   :  { %v322_v58 = vpop.f32.mrf.mxu1 }
 0x2d8   :  { %241 = vst.msk [vmem:[#allocation3 + $0x8] sm:$0xff] %vm35_vm0, %v239_v57 }
 0x2db   :  { %v245_v60 = vld [vmem:[#allocation3] sm:$0xff] }
 0x2dc   :  { %v254_v61 = vadd.f32 %v286_v59, %v245_v60 }
 0x2de   :  { %v258_v62 = vadd.f32 %v254_v61, %v85_v35 }
 0x2df   :  { %v246_v63 = vld [vmem:[#allocation3 + $0x8] sm:$0xff] }
 0x2e0   :  { %v289_v0 = vpack.c.bf16 %v258_v62, %v258_v62  ;;  %v255_v1 = vadd.f32 %v286_v59, %v246_v63 }
 0x2e2   :  { %269 = vst.msk [vmem:[%s434_s7] sm:$0xf] %vm268_vm3, %v289_v0  ;;  %v259_v2 = vadd.f32 %v255_v1, %v86_v36 }
 0x2e4   :  { %v290_v3 = vpack.c.bf16 %v259_v2, %v259_v2 }
 0x2e6   :  { %270 = vst.msk [vmem:[%s434_s7 + $0x4] sm:$0xf] %vm268_vm3, %v290_v3 }

// kernel: transformer_forward.7
= control target key start
LH: loop header
LB: loop body
LE: loop exit
PB: predicated region body
PF: predicated region fallthrough
CT: control target
= control target key end

     0   :  { %s1545_s21 = smov 0   ;;  %s1547_s22 = smov 0   ;;  %s1770_s0 = inlined_call_operand.vmem [shape: bf16[2,4,8,8], index: 0, kind: input, shape index: {}]   ;;  %s1771_s1 = inlined_call_operand.vmem [shape: bf16[2,4,8,8], index: 1, kind: input, shape index: {}]   ;;  %s1772_s2 = inlined_call_operand.vmem [shape: bf16[2,4,8,8], index: 2, kind: input, shape index: {}]   ;;  %s1773_s3 = inlined_call_operand.vmem [shape: bf16[2,8,32], index: 3, kind: input, shape index: {}]   ;;  %s1774_s4 = inlined_call_operand.vmem [shape: bf16[4,8,32], index: 4, kind: input, shape index: {}]   ;;  %s1775_s5 = inlined_call_operand.vmem [shape: f32[1,32], index: 5, kind: input, shape index: {}]   ;;  %s1776_s6 = inlined_call_operand.vmem [shape: bf16[2,8,32], index: 6, kind: output, shape index: {}]  }
   0x1   :  { %s1549_s23 = smov 0  }
   0x2 LB: > { %s35_s24 = sadd.s32 1, %s1500_s22  ;;  %p1302_p0 = scmp.ge.s32.totalorder %s1504_s23, 1  ;;  %s1504_s23 = sphi %s1549_s23, %s16_s23   ;;  %s1500_s22 = sphi %s1547_s22, %s1778_s22   ;;  %s1496_s21 = sphi %s1545_s21, %s1777_s21  }
   0x3   : > { %p37_p1 = scmp.ge.s32.totalorder %s35_s24, 2  ;;  %p282_p2 = scmp.lt.s32.totalorder %s1504_s23, 3 }
   0x5   : > { %s1780_s24 = smov (%p37_p1, %s35_s24), 0  ;;  %p283_p3 = pnand %p1302_p0, %p282_p2 }
   0x6   : > { %p340_p4 = scmp.lt.s32.totalorder (!%p283_p3), %s1496_s21, 1 }
   0x7   : > { %286 = sbr.rel (%p283_p3) target bundleno = 1002 (0x3ea), region = 44 }
   0xc   : > { %vm392_vm0 = vcmask 64512   ;;  %v1506_v0 = vmov 0.0   ;;  %s1782_s21 = smov (!%p340_p4, %s1496_s21), 1  ;;  %vm1507_vm1 = vmmov 0   ;;  %vm383_vm2 = vcmask 7168  }
   0xd   : > { %1356 = vmatprep.subr.bf16.mxu0 %v1506_v0  ;;  %1362 = vmatprep.subr.bf16.mxu1 %v1506_v0  ;;  %393 = vst.msk [vmem:[#allocation4] sm:$0xff] %vm392_vm0, %v1506_v0  ;;  %394 = vst.msk [vmem:[#allocation4 + $0x8] sm:$0xff] %vm392_vm0, %v1506_v0  ;;  %s1580_s25 = sshll.u32 %s1782_s21, 4  ;;  %v1508_v13 = vmov -inf   ;;  %v1509_v32 = vmov 0   ;;  %vm722_vm3 = vcmask 1043456  }
   0xe   : > { %395 = vst.msk [vmem:[#allocation4 + $0x10] sm:$0xff] %vm392_vm0, %v1506_v0  ;;  %396 = vst.msk [vmem:[#allocation4 + $0x18] sm:$0xff] %vm392_vm0, %v1506_v0  ;;  %1358 = vmatprep.mubr.msk.bf16.mxu0 %vm1507_vm1, %v1506_v0  ;;  %1364 = vmatprep.mubr.msk.bf16.mxu1 %vm1507_vm1, %v1506_v0  ;;  %s355_s28 = scalar_lea.vmem %s1771_s1, %s1580_s25  ;;  %s347_s7 = scalar_lea.vmem %s1770_s0, %s1580_s25  ;;  %vm1165_vm4 = vcmask 257024  }
   0xf   : > { %v401_v1 = vld [vmem:[%s355_s28] sm:$0xf]  ;;  %v402_v2 = vld [vmem:[%s355_s28 + $0x4] sm:$0xf]  ;;  %v403_v5 = vld [vmem:[%s355_s28 + $0x8] sm:$0xf]  ;;  %1456 = vset.pattern.permute.xlu0 %v1509_v32  ;;  %1457 = vset.pattern.permute.xlu1 %v1509_v32  ;;  %s1671_s10 = scalar_lea.vmem %s1772_s2, %s1580_s25 }
  0x10   : > { %v410_v3 = vsel %vm392_vm0, %v401_v1, 0  ;;  %v456_v4 = vsel %vm392_vm0, %v402_v2, 0  ;;  %v404_v6 = vld [vmem:[%s355_s28 + $0xc] sm:$0xf]  ;;  %v397_v7 = vld [vmem:[%s347_s7] sm:$0xf] }
  0x11   : > { %1357 = vmatpush3.bf16.xpose.msra.mxu0 %v410_v3  ;;  %1363 = vmatpush3.bf16.xpose.msra.mxu1 %v456_v4  ;;  %v398_v8 = vld [vmem:[%s347_s7 + $0x4] sm:$0xf]  ;;  %v502_v9 = vsel %vm392_vm0, %v403_v5, 0  ;;  %v548_v10 = vsel %vm392_vm0, %v404_v6, 0  ;;  %v399_v11 = vld [vmem:[%s347_s7 + $0x8] sm:$0xf] }
  0x12   : > { %1368 = vmatprep.subr.bf16.mxu0 %v1506_v0  ;;  %1374 = vmatprep.subr.bf16.mxu1 %v1506_v0  ;;  %v400_v12 = vld [vmem:[%s347_s7 + $0xc] sm:$0xf]  ;;  %384 = vst.msk [vmem:[#allocation2] sm:$0xff] %vm383_vm2, %v1508_v13  ;;  %385 = vst.msk [vmem:[#allocation2 + $0x8] sm:$0xff] %vm383_vm2, %v1508_v13  ;;  %v715_v50 = vld [vmem:[%s1671_s10] sm:$0xf] }
  0x13   : > { %386 = vst.msk [vmem:[#allocation2 + $0x10] sm:$0xff] %vm383_vm2, %v1508_v13  ;;  %387 = vst.msk [vmem:[#allocation2 + $0x18] sm:$0xff] %vm383_vm2, %v1508_v13  ;;  %v724_v52 = vsel %vm722_vm3, %v715_v50, 0  ;;  %v716_v53 = vld [vmem:[%s1671_s10 + $0x4] sm:$0xf]  ;;  %s1309_s19 = sshll.u32 %s1782_s21, 2 }
  0x14   : > { %388 = vst.msk [vmem:[#allocation3] sm:$0xff] %vm383_vm2, %v1506_v0  ;;  %389 = vst.msk [vmem:[#allocation3 + $0x8] sm:$0xff] %vm383_vm2, %v1506_v0  ;;  %v770_v54 = vsel %vm722_vm3, %v716_v53, 0  ;;  %v717_v4 = vld [vmem:[%s1671_s10 + $0x8] sm:$0xf]  ;;  %s370_s26 = scalar_lea.vmem %s1773_s3, %s1309_s19  ;;  %s377_s30 = scalar_lea.vmem %s1776_s6, %s1309_s19 }
  0x15   : > { %390 = vst.msk [vmem:[#allocation3 + $0x10] sm:$0xff] %vm383_vm2, %v1506_v0  ;;  %391 = vst.msk [vmem:[#allocation3 + $0x18] sm:$0xff] %vm383_vm2, %v1506_v0  ;;  %v1321_v50 = vld [vmem:[%s1774_s4 + $0x4] sm:$0xf] }
  0x18   : > { %1359 = vmatmul.mubr.msk.bf16.vlgmr.msra.gmra.mxu0 %vm392_vm0, %v397_v7  ;;  %1365 = vmatmul.mubr.msk.bf16.vlgmr.msra.gmra.mxu1 %vm392_vm0, %v398_v8  ;;  %v816_v8 = vsel %vm722_vm3, %v717_v4, 0 }
  0x19   : > { %1369 = vmatpush3.bf16.xpose.msra.mxu0 %v502_v9  ;;  %1375 = vmatpush3.bf16.xpose.msra.mxu1 %v548_v10  ;;  %v1632_v35 = vld [vmem:[#allocation2] sm:$0xff]  ;;  %v1637_v38 = vld [vmem:[#allocation2 + $0x8] sm:$0xff] }
  0x1a   : > { %1370 = vmatprep.mubr.msk.bf16.mxu0 %vm1507_vm1, %v1506_v0  ;;  %1376 = vmatprep.mubr.msk.bf16.mxu1 %vm1507_vm1, %v1506_v0  ;;  %v1647_v42 = vld [vmem:[#allocation2 + $0x10] sm:$0xff]  ;;  %v1657_v46 = vld [vmem:[#allocation2 + $0x18] sm:$0xff]  ;;  %v718_v9 = vld [vmem:[%s1671_s10 + $0xc] sm:$0xf] }
  0x1b   : > { %1380 = vmatprep.subr.bf16.mxu0 %v1506_v0  ;;  %1386 = vmatprep.subr.bf16.mxu1 %v1506_v0  ;;  %v862_v13 = vsel %vm722_vm3, %v718_v9, 0 }
  0x20   : > { %1371 = vmatmul.mubr.msk.bf16.vlgmr.msra.gmra.mxu0 %vm392_vm0, %v399_v11  ;;  %1377 = vmatmul.mubr.msk.bf16.vlgmr.msra.gmra.mxu1 %vm392_vm0, %v400_v12 }
  0x21   : > { %1382 = vmatprep.mubr.msk.bf16.mxu0 %vm1507_vm1, %v1506_v0  ;;  %1388 = vmatprep.mubr.msk.bf16.mxu1 %vm1507_vm1, %v1506_v0 }
  0x22   : > { %1381 = vmatpush3.bf16.msra.mxu0 %v724_v52  ;;  %1387 = vmatpush3.bf16.msra.mxu1 %v770_v54  ;;  %v1023_v52 = vsel %vm722_vm3, %v1321_v50, 0 }
  0x23   : > { %1392 = vmatprep.subr.bf16.mxu0 %v1506_v0  ;;  %1398 = vmatprep.subr.bf16.mxu1 %v1506_v0 }
  0xd8   : > { %v1622_v14 = vpop.f32.mrf.mxu0  ;;  %v1624_v15 = vpop.f32.mrf.mxu1 }
  0xd9   : > { %v594_v16 = vsel %vm392_vm0, %v1622_v14, -inf  ;;  %v597_v19 = vsel %vm392_vm0, %v1624_v15, -inf }
  0xda   : > { %v1366_v17 = vpop.f32.mrf.mxu1  ;;  %595 = vmax.xlane.f32.xlu0 %v594_v16  ;;  %v1360_v18 = vpop.f32.mrf.mxu0 }
  0xdc   : > { %v449_v20 = vpop.f32.mrf.mxu0  ;;  %v495_v21 = vpop.f32.mrf.mxu1 }
  0xde   : > { %v1367_v22 = vpop.f32.mrf.mxu1  ;;  %598 = vmax.xlane.f32.xlu0 %v597_v19  ;;  %v1361_v23 = vpop.f32.mrf.mxu0 }
  0xe0   : > { %v538_v24 = vpop.f32.mrf.mxu0  ;;  %v584_v25 = vpop.f32.mrf.mxu1 }
  0xe1   : > { %v600_v26 = vsel %vm392_vm0, %v538_v24, -inf  ;;  %v603_v29 = vsel %vm392_vm0, %v584_v25, -inf }
  0xe2   : > { %v1378_v27 = vpop.f32.mrf.mxu1  ;;  %601 = vmax.xlane.f32.xlu1 %v600_v26  ;;  %v1372_v28 = vpop.f32.mrf.mxu0 }
  0xe3   : > { %v654_v28 = vld [vmem:[#allocation3] sm:$0xff] }
  0xe4   : > { %v541_v30 = vpop.f32.mrf.mxu0  ;;  %v587_v31 = vpop.f32.mrf.mxu1 }
  0xe5   : > { %v655_v31 = vld [vmem:[#allocation3 + $0x8] sm:$0xff] }
  0xe6   : > { %v1379_v33 = vpop.f32.mrf.mxu1  ;;  %604 = vmax.xlane.f32.xlu1 %v603_v29  ;;  %v1373_v34 = vpop.f32.mrf.mxu0 }
 0x163   : > { %v596_v36 = vpop.xlane.xlu0 %595 }
 0x164   : > { %v1635_v37 = vmax.f32 %v1632_v35, %v596_v36 }
 0x166   : > { %v610_v39 = vsub.f32 %v1632_v35, %v1635_v37  ;;  %912 = vst.msk [vmem:[#allocation2] sm:$0xff] %vm383_vm2, %v1635_v37  ;;  %624 = vperm.xlu0 %1456, %v1635_v37   ;;  %v656_v35 = vld [vmem:[#allocation3 + $0x10] sm:$0xff] }
 0x167   : > { %v599_v40 = vpop.xlane.xlu0 %598 }
 0x168   : > { %v1645_v41 = vmax.f32 %v1637_v38, %v599_v40  ;;  %v614_v19 = vmul.f32 1.442695, %v610_v39  ;;  %v657_v39 = vld [vmem:[#allocation3 + $0x18] sm:$0xff] }
 0x16a   : > { %v611_v43 = vsub.f32 %v1637_v38, %v1645_v41  ;;  %913 = vst.msk [vmem:[#allocation2 + $0x8] sm:$0xff] %vm383_vm2, %v1645_v41  ;;  %629 = vperm.xlu1 %1457, %v1645_v41  }
 0x16b   : > { %v602_v44 = vpop.xlane.xlu1 %601 }
 0x16c   : > { %v1655_v45 = vmax.f32 %v1647_v42, %v602_v44  ;;  %v616_v17 = vmul.f32 1.442695, %v611_v43 }
 0x16e   : > { %v612_v47 = vsub.f32 %v1647_v42, %v1655_v45  ;;  %914 = vst.msk [vmem:[#allocation2 + $0x10] sm:$0xff] %vm383_vm2, %v1655_v45  ;;  %634 = vperm.xlu1 %1457, %v1655_v45  }
 0x16f   : > { %v605_v48 = vpop.xlane.xlu1 %604 }
 0x170   : > { %v1665_v49 = vmax.f32 %v1657_v46, %v605_v48  ;;  %v618_v22 = vmul.f32 1.442695, %v612_v47  ;;  %v969_v47 = vld [vmem:[%s1774_s4] sm:$0xf] }
 0x171   : > { %v974_v48 = vsel %vm722_vm3, %v969_v47, 0 }
 0x172   : > { %v613_v51 = vsub.f32 %v1657_v46, %v1665_v49  ;;  %915 = vst.msk [vmem:[#allocation2 + $0x18] sm:$0xff] %vm383_vm2, %v1665_v49  ;;  %639 = vperm.xlu1 %1457, %v1665_v49  }
 0x174   : > { %v620_v23 = vmul.f32 1.442695, %v613_v51 }
 0x1e1   : > { %v625_v55 = vpop.permute.xlu0 %624 }
 0x1e2   : > { %v642_v56 = vsub.f32 %v1622_v14, %v625_v55 }
 0x1e4   : > { %v646_v57 = vmul.f32 1.442695, %v642_v56 }
 0x1e5   : > { %v630_v58 = vpop.permute.xlu1 %629 }
 0x1e6   : > { %1458 = vpow2.f32 %v646_v57  ;;  %v643_v59 = vsub.f32 %v1624_v15, %v630_v58  ;;  %v683_v57 = vld [vmem:[#allocation4] sm:$0xff] }
 0x1e8   : > { %v648_v60 = vmul.f32 1.442695, %v643_v59  ;;  %v684_v59 = vld [vmem:[#allocation4 + $0x8] sm:$0xff] }
 0x1e9   : > { %v635_v61 = vpop.permute.xlu1 %634 }
 0x1ea   : > { %1460 = vpow2.f32 %v648_v60  ;;  %v644_v62 = vsub.f32 %v538_v24, %v635_v61 }
 0x1ec   : > { %v650_v63 = vmul.f32 1.442695, %v644_v62 }
 0x1ed   : > { %v640_v1 = vpop.permute.xlu1 %639 }
 0x1ee   : > { %1462 = vpow2.f32 %v650_v63  ;;  %v645_v2 = vsub.f32 %v584_v25, %v640_v1 }
 0x1f0   : > { %v652_v3 = vmul.f32 1.442695, %v645_v2 }
 0x1f2   : > { %1464 = vpow2.f32 %v652_v3  ;;  %v685_v3 = vld [vmem:[#allocation4 + $0x10] sm:$0xff] }
 0x1f3   : > { %v1459_v5 = vpop.eup %1458  ;;  %1466 = vpow2.f32 %v616_v17 }
 0x1f4   : > { %v662_v6 = vsel %vm392_vm0, %v1459_v5, 0.0  ;;  %v711_v7 = vpack.c.bf16 %v1459_v5, %v1459_v5  ;;  %1468 = vpow2.f32 %v614_v19 }
 0x1f5   : > { %663 = vadd.xlane.f32.xlu1 %v662_v6  ;;  %1470 = vpow2.f32 %v618_v22 }
 0x1f6   : > { %1383 = vmatmul.mubr.msk.bf16.vlgmr.msra.gmra.mxu0 %vm392_vm0, %v711_v7  ;;  %1472 = vpow2.f32 %v620_v23 }
 0x1f7   : > { %v1461_v10 = vpop.eup %1460  ;;  %1393 = vmatpush3.bf16.msra.mxu0 %v816_v8  ;;  %1394 = vmatprep.mubr.msk.bf16.mxu0 %vm1507_vm1, %v1506_v0 }
 0x1f8   : > { %v665_v11 = vsel %vm392_vm0, %v1461_v10, 0.0  ;;  %v712_v12 = vpack.c.bf16 %v1461_v10, %v1461_v10  ;;  %1404 = vmatprep.subr.bf16.mxu0 %v1506_v0 }
 0x1f9   : > { %666 = vadd.xlane.f32.xlu0 %v665_v11  ;;  %v686_v11 = vld [vmem:[#allocation4 + $0x18] sm:$0xff] }
 0x1fa   : > { %1389 = vmatmul.mubr.msk.bf16.vlgmr.msra.gmra.mxu1 %vm392_vm0, %v712_v12 }
 0x1fb   : > { %v1463_v14 = vpop.eup %1462  ;;  %1399 = vmatpush3.bf16.msra.mxu1 %v862_v13  ;;  %1400 = vmatprep.mubr.msk.bf16.mxu1 %vm1507_vm1, %v1506_v0 }
 0x1fc   : > { %v668_v15 = vsel %vm392_vm0, %v1463_v14, 0.0  ;;  %v713_v16 = vpack.c.bf16 %v1463_v14, %v1463_v14  ;;  %1410 = vmatprep.subr.bf16.mxu1 %v1506_v0 }
 0x1fd   : > { %669 = vadd.xlane.f32.xlu1 %v668_v15 }
 0x1fe   : > { %1395 = vmatmul.mubr.msk.bf16.vlgmr.msra.gmra.mxu0 %vm392_vm0, %v713_v16 }
 0x1ff   : > { %v1465_v18 = vpop.eup %1464  ;;  %1406 = vmatprep.mubr.msk.bf16.mxu0 %vm1507_vm1, %v1506_v0  ;;  %1405 = vmatpush3.bf16.msra.mxu0 %v974_v48 }
 0x200   : > { %v671_v20 = vsel %vm392_vm0, %v1465_v18, 0.0  ;;  %v714_v21 = vpack.c.bf16 %v1465_v18, %v1465_v18  ;;  %v1467_v24 = vpop.eup %1466  ;;  %1416 = vmatprep.subr.bf16.mxu0 %v1506_v0 }
 0x201   : > { %672 = vadd.xlane.f32.xlu1 %v671_v20  ;;  %v1469_v25 = vpop.eup %1468  ;;  %v659_v33 = vmul.f32 %v1467_v24, %v655_v31 }
 0x202   : > { %1401 = vmatmul.mubr.msk.bf16.vlgmr.msra.gmra.mxu1 %vm392_vm0, %v714_v21  ;;  %v1471_v26 = vpop.eup %1470  ;;  %v658_v29 = vmul.f32 %v1469_v25, %v654_v28 }
 0x203   : > { %1412 = vmatprep.mubr.msk.bf16.mxu1 %vm1507_vm1, %v1506_v0  ;;  %v1473_v27 = vpop.eup %1472  ;;  %v660_v37 = vmul.f32 %v1471_v26, %v656_v35  ;;  %1411 = vmatpush3.bf16.msra.mxu1 %v1023_v52 }
 0x204   : > { %v661_v42 = vmul.f32 %v1473_v27, %v657_v39  ;;  %1422 = vmatprep.subr.bf16.mxu1 %v1506_v0 }
 0x20f   : > { %694 = vperm.xlu0 %1456, %v1467_v24  }
 0x212   : > { %689 = vperm.xlu1 %1457, %v1469_v25  }
 0x216   : > { %699 = vperm.xlu1 %1457, %v1471_v26  }
 0x21a   : > { %704 = vperm.xlu1 %1457, %v1473_v27   ;;  %v1323_v27 = vld [vmem:[%s1774_s4 + $0x8] sm:$0xf] }
 0x27e   : > { %v664_v30 = vpop.xlane.xlu1 %663 }
 0x27f   : > { %v674_v32 = vadd.f32 %v664_v30, %v658_v29  ;;  %v1072_v30 = vsel %vm722_vm3, %v1323_v27, 0 }
 0x281   : > { %679 = vst.msk [vmem:[#allocation3] sm:$0xff] %vm383_vm2, %v674_v32 }
 0x282   : > { %v667_v34 = vpop.xlane.xlu0 %666 }
 0x283   : > { %v675_v36 = vadd.f32 %v667_v34, %v659_v33  ;;  %v1325_v33 = vld [vmem:[%s1774_s4 + $0xc] sm:$0xf] }
 0x285   : > { %680 = vst.msk [vmem:[#allocation3 + $0x8] sm:$0xff] %vm383_vm2, %v675_v36  ;;  %v1121_v36 = vsel %vm722_vm3, %v1325_v33, 0 }
 0x286   : > { %v670_v38 = vpop.xlane.xlu1 %669 }
 0x287   : > { %v676_v40 = vadd.f32 %v670_v38, %v660_v37 }
 0x288   : > { %v919_v41 = vld [vmem:[#allocation3] sm:$0xff] }
 0x289   : > { %681 = vst.msk [vmem:[#allocation3 + $0x10] sm:$0xff] %vm383_vm2, %v676_v40  ;;  %1474 = vrcp.f32 %v919_v41 }
 0x28a   : > { %v673_v43 = vpop.xlane.xlu1 %672  ;;  %v695_v60 = vpop.permute.xlu0 %694 }
 0x28b   : > { %v677_v44 = vadd.f32 %v673_v43, %v661_v42  ;;  %v708_v2 = vmul.f32 %v695_v60, %v684_v59 }
 0x28c   : > { %v920_v45 = vld [vmem:[#allocation3 + $0x8] sm:$0xff] }
 0x28d   : > { %682 = vst.msk [vmem:[#allocation3 + $0x18] sm:$0xff] %vm383_vm2, %v677_v44  ;;  %1476 = vrcp.f32 %v920_v45  ;;  %v959_v45 = vld [vmem:[%s370_s26] sm:$0xf] }
 0x28e   : > { %v690_v56 = vpop.permute.xlu1 %689 }
 0x28f   : > { %v707_v58 = vmul.f32 %v690_v56, %v683_v57 }
 0x290   : > { %v921_v46 = vld [vmem:[#allocation3 + $0x10] sm:$0xff] }
 0x291   : > { %1478 = vrcp.f32 %v921_v46  ;;  %v960_v46 = vunpack.c.l.bf16 %v959_v45 }
 0x292   : > { %v700_v62 = vpop.permute.xlu1 %699 }
 0x293   : > { %v709_v9 = vmul.f32 %v700_v62, %v685_v3 }
 0x294   : > { %v922_v49 = vld [vmem:[#allocation3 + $0x18] sm:$0xff] }
 0x295   : > { %1480 = vrcp.f32 %v922_v49 }
 0x296   : > { %v1475_v51 = vpop.eup %1474  ;;  %v705_v10 = vpop.permute.xlu1 %704 }
 0x297   : > { %933 = vperm.xlu1 %1457, %v1475_v51   ;;  %v710_v17 = vmul.f32 %v705_v10, %v686_v11 }
 0x29a   : > { %v1477_v53 = vpop.eup %1476 }
 0x29b   : > { %938 = vperm.xlu0 %1456, %v1477_v53  }
 0x29e   : > { %v1479_v54 = vpop.eup %1478 }
 0x29f   : > { %943 = vperm.xlu1 %1457, %v1479_v54  }
 0x2a2   : > { %v1481_v55 = vpop.eup %1480 }
 0x2a3   : > { %948 = vperm.xlu0 %1456, %v1481_v55  }
 0x2b6   : > { %v760_v61 = vpop.f32.mrf.mxu0 }
 0x2b7   : > { %v904_v63 = vadd.f32 %v760_v61, %v707_v58 }
 0x2b8   : > { %v1384_v1 = vpop.f32.mrf.mxu0 }
 0x2b9   : > { %908 = vst.msk [vmem:[#allocation4] sm:$0xff] %vm392_vm0, %v904_v63 }
 0x2ba   : > { %v763_v4 = vpop.f32.mrf.mxu0  ;;  %v806_v5 = vpop.f32.mrf.mxu1 }
 0x2bb   : > { %v905_v6 = vadd.f32 %v806_v5, %v708_v2 }
 0x2bc   : > { %v1385_v7 = vpop.f32.mrf.mxu0  ;;  %v1390_v8 = vpop.f32.mrf.mxu1 }
 0x2bd   : > { %909 = vst.msk [vmem:[#allocation4 + $0x8] sm:$0xff] %vm392_vm0, %v905_v6 }
 0x2be   : > { %v809_v12 = vpop.f32.mrf.mxu1  ;;  %v852_v13 = vpop.f32.mrf.mxu0 }
 0x2bf   : > { %v906_v14 = vadd.f32 %v852_v13, %v709_v9 }
 0x2c0   : > { %v1391_v15 = vpop.f32.mrf.mxu1  ;;  %v1396_v16 = vpop.f32.mrf.mxu0  ;;  %v927_v26 = vld [vmem:[#allocation4] sm:$0xff] }
 0x2c1   : > { %910 = vst.msk [vmem:[#allocation4 + $0x10] sm:$0xff] %vm392_vm0, %v906_v14 }
 0x2c2   : > { %v855_v18 = vpop.f32.mrf.mxu0  ;;  %v898_v19 = vpop.f32.mrf.mxu1 }
 0x2c3   : > { %v907_v20 = vadd.f32 %v898_v19, %v710_v17 }
 0x2c4   : > { %v1397_v21 = vpop.f32.mrf.mxu0  ;;  %v1402_v22 = vpop.f32.mrf.mxu1  ;;  %v928_v31 = vld [vmem:[#allocation4 + $0x8] sm:$0xff] }
 0x2c5   : > { %911 = vst.msk [vmem:[#allocation4 + $0x18] sm:$0xff] %vm392_vm0, %v907_v20 }
 0x2c6   : > { %v901_v23 = vpop.f32.mrf.mxu1 }
 0x2c8   : > { %v1403_v24 = vpop.f32.mrf.mxu1  ;;  %v929_v38 = vld [vmem:[#allocation4 + $0x10] sm:$0xff] }
 0x2cc   : > { %v930_v42 = vld [vmem:[#allocation4 + $0x18] sm:$0xff] }
 0x312   : > { %v934_v25 = vpop.permute.xlu1 %933 }
 0x313   : > { %v951_v28 = vmul.f32 %v934_v25, %v927_v26 }
 0x315   : > { %v955_v29 = vpack.c.bf16 %v951_v28, %v951_v28 }
 0x316   : > { %v939_v32 = vpop.permute.xlu0 %938 }
 0x317   : > { %v952_v34 = vmul.f32 %v939_v32, %v928_v31  ;;  %1407 = vmatmul.mubr.msk.bf16.vlgmr.msra.gmra.mxu0 %vm392_vm0, %v955_v29 }
 0x318   : > { %1417 = vmatpush3.bf16.msra.mxu0 %v1072_v30  ;;  %1418 = vmatprep.mubr.msk.bf16.mxu0 %vm1507_vm1, %v1506_v0 }
 0x319   : > { %v956_v35 = vpack.c.bf16 %v952_v34, %v952_v34 }
 0x31a   : > { %v944_v37 = vpop.permute.xlu1 %943 }
 0x31b   : > { %v953_v39 = vmul.f32 %v944_v37, %v929_v38  ;;  %1413 = vmatmul.mubr.msk.bf16.vlgmr.msra.gmra.mxu1 %vm392_vm0, %v956_v35 }
 0x31c   : > { %1423 = vmatpush3.bf16.msra.mxu1 %v1121_v36  ;;  %1424 = vmatprep.mubr.msk.bf16.mxu1 %vm1507_vm1, %v1506_v0  ;;  %v1319_v0 = vld [vmem:[%s1775_s5] ss:$0 sm:$0xff] }
 0x31d   : > { %v957_v40 = vpack.c.bf16 %v953_v39, %v953_v39  ;;  %v968_v49 = vadd.f32 %v1319_v0, %v960_v46 }
 0x31e   : > { %v949_v41 = vpop.permute.xlu0 %948 }
 0x31f   : > { %v954_v43 = vmul.f32 %v949_v41, %v930_v42  ;;  %1419 = vmatmul.mubr.msk.bf16.vlgmr.msra.gmra.mxu0 %vm392_vm0, %v957_v40 }
 0x321   : > { %v958_v44 = vpack.c.bf16 %v954_v43, %v954_v43 }
 0x323   : > { %1425 = vmatmul.mubr.msk.bf16.vlgmr.msra.gmra.mxu1 %vm392_vm0, %v958_v44 }
 0x3d7   : > { %v1010_v47 = vpop.f32.mrf.mxu0 }
 0x3d8   : > { %v1016_v54 = vadd.f32 %v1010_v47, %v968_v49 }
 0x3d9   : > { %v1408_v48 = vpop.f32.mrf.mxu0 }
 0x3db   : > { %v1013_v50 = vpop.f32.mrf.mxu0  ;;  %v1059_v51 = vpop.f32.mrf.mxu1 }
 0x3dc   : > { %v1065_v57 = vadd.f32 %v1059_v51, %v1016_v54 }
 0x3dd   : > { %v1409_v52 = vpop.f32.mrf.mxu0  ;;  %v1414_v53 = vpop.f32.mrf.mxu1 }
 0x3df   : > { %v1062_v55 = vpop.f32.mrf.mxu1  ;;  %v1108_v56 = vpop.f32.mrf.mxu0 }
 0x3e0   : > { %v1114_v60 = vadd.f32 %v1108_v56, %v1065_v57 }
 0x3e1   : > { %v1415_v58 = vpop.f32.mrf.mxu1  ;;  %v1420_v59 = vpop.f32.mrf.mxu0 }
 0x3e3   : > { %v1111_v61 = vpop.f32.mrf.mxu0  ;;  %v1157_v62 = vpop.f32.mrf.mxu1 }
 0x3e4   : > { %v1163_v63 = vadd.f32 %v1157_v62, %v1114_v60 }
 0x3e5   : > { %v1421_v1 = vpop.f32.mrf.mxu0  ;;  %v1426_v2 = vpop.f32.mrf.mxu1 }
 0x3e6   : > { %v1164_v3 = vpack.c.bf16 %v1163_v63, %v1163_v63 }
 0x3e7   : > { %v1160_v4 = vpop.f32.mrf.mxu1 }
 0x3e8   : > { %1166 = vst.msk [vmem:[%s377_s30] sm:$0xf] %vm1165_vm4, %v1164_v3 }
 0x3e9   : > { %v1427_v5 = vpop.f32.mrf.mxu1 }
 0x3ea PF: > { %s16_s23 = sadd.s32 1, %s1504_s23   ;;  %s1777_s21 = smov %s1500_s22 }
 0x3eb   : > { %p13_p5 = scmp.ge.s32.totalorder %s16_s23, 4   ;;  %s1778_s22 = smov %s1780_s24 }
 0x3ed   :  { %15 = sbr.rel (!%p13_p5) target bundleno = 2 (0x2), region = 94 }

</bundles_post_ra>
